<compile_context>
chip_gen: v7x
topology: tpu7x:2x2x1
jax: 0.10.0
libtpu: 0.0.40
codegen_flags: <defaults>
</compile_context>

<pallas_src>
import jax
import jax.numpy as jnp
from jax.experimental import pallas as pl
from jax.experimental.pallas import tpu as pltpu

H1 = 512
H2 = 256


def _leaky_relu(x, slope=0.2):
    return jnp.where(x > 0, x, slope * x)


def wgan_disc_kernel(x_ref, w1_ref, b1_ref, w2_ref, b2_ref, w3_ref, b3_ref, o_ref):
    """One batch tile of the 3-layer MLP.

    x_ref : (TILE_B, D)  bf16   (pipelined per grid step)
    w1_ref: (D, 512)     bf16   (resident)     b1_ref: (1, 512) f32
    w2_ref: (512, 256)   bf16   (resident)     b2_ref: (1, 256) f32
    w3_ref: (1, 256)     f32    (resident, VPU path)
    b3_ref: (1,)         f32    SMEM scalar
    o_ref : (TILE_B, 1)  f32
    """
    # Layer 1: bf16 operands on the MXU, f32 accumulation.
    h1 = jnp.dot(x_ref[...], w1_ref[...], preferred_element_type=jnp.float32)
    h1 = _leaky_relu(h1 + b1_ref[...])

    # Layer 2: same MXU path.
    h2 = jnp.dot(h1.astype(jnp.bfloat16), w2_ref[...],
                 preferred_element_type=jnp.float32)
    h2 = _leaky_relu(h2 + b2_ref[...])

    # Layer 3 (N=1): VPU multiply + XLU lane reduction instead of MXU matmul.
    out = jnp.sum(h2 * w3_ref[...], axis=-1, keepdims=True) + b3_ref[0]
    o_ref[...] = out.astype(o_ref.dtype)


def _round_up(x, m):
    return (x + m - 1) // m * m


def wgan_discriminator(img, params, *, tile_b=256):
    """img: (B, C, H, W) float32. Returns validity: (B, 1) float32."""
    w1, b1, w2, b2, w3, b3 = params
    B = img.shape[0]
    D = 1
    for s in img.shape[1:]:
        D *= s
    x = img.reshape(B, D)  # matches img.view(B, -1)

    # Batch tiling: >=8 rows (sublane), pad B up to a tile multiple.
    tile_b = min(tile_b, _round_up(B, 8))
    B_pad = _round_up(B, tile_b)
    if B_pad != B:
        x = jnp.pad(x, ((0, B_pad - B), (0, 0)))
    nb = B_pad // tile_b

    # bf16 operands for the MXU; biases / w3 row / accumulation stay f32.
    x_bf16 = x.astype(jnp.bfloat16)
    w1_bf16 = w1.astype(jnp.bfloat16)
    w2_bf16 = w2.astype(jnp.bfloat16)
    w3_row = w3.reshape(1, H2).astype(jnp.float32)
    b3_s = b3.reshape(1).astype(jnp.float32)

    flops = 2 * B_pad * (D * H1 + H1 * H2 + H2)
    bytes_accessed = (x_bf16.size * 2 + w1_bf16.size * 2 + w2_bf16.size * 2
                      + (b1.size + b2.size + w3_row.size + b3_s.size) * 4
                      + B_pad * 4)

    # VMEM budget: double-buffered x/out tiles + resident weights + activations.
    vmem_needed = (2 * tile_b * D * 2          # x tiles (bf16, 2 buffers)
                   + D * H1 * 2 + H1 * H2 * 2  # W1, W2 (bf16, resident)
                   + (H1 + 2 * H2) * 4         # b1, b2, w3 row
                   + 2 * tile_b * 4            # out tiles (2 buffers)
                   + tile_b * (H1 + H2) * 4)   # h1/h2 live values
    vmem_limit = max(32 * 1024 * 1024, min(64 * 1024 * 1024, 2 * vmem_needed))

    out = pl.pallas_call(
        wgan_disc_kernel,
        out_shape=jax.ShapeDtypeStruct((B_pad, 1), jnp.float32),
        grid_spec=pltpu.PrefetchScalarGridSpec(
            num_scalar_prefetch=0,
            grid=(nb,),
            in_specs=[
                pl.BlockSpec((tile_b, D), lambda i: (i, 0)),        # x (pipelined)
                pl.BlockSpec((D, H1), lambda i: (0, 0)),            # W1 (resident)
                pl.BlockSpec((1, H1), lambda i: (0, 0)),            # b1
                pl.BlockSpec((H1, H2), lambda i: (0, 0)),           # W2 (resident)
                pl.BlockSpec((1, H2), lambda i: (0, 0)),            # b2
                pl.BlockSpec((1, H2), lambda i: (0, 0)),            # w3 row (VPU)
                pl.BlockSpec(memory_space=pltpu.MemorySpace.SMEM),  # b3 scalar
            ],
            out_specs=pl.BlockSpec((tile_b, 1), lambda i: (i, 0)),
        ),
        compiler_params=pltpu.CompilerParams(
            dimension_semantics=("parallel",),
            vmem_limit_bytes=vmem_limit,
        ),
        cost_estimate=pl.CostEstimate(
            flops=flops, transcendentals=0, bytes_accessed=bytes_accessed),
    )(x_bf16, w1_bf16, b1, w2_bf16, b2, w3_row, b3_s)

    return out[:B]


def init_params(key, in_features):
    """Deterministic synthetic parameters matching the nn.Linear shapes."""
    ks = jax.random.split(key, 6)

    def lin(kw, kb, fan_in, fan_out):
        lim = 1.0 / jnp.sqrt(jnp.float32(fan_in))
        w = jax.random.uniform(kw, (fan_in, fan_out), jnp.float32, -lim, lim)
        b = jax.random.uniform(kb, (1, fan_out), jnp.float32, -lim, lim)
        return w, b

    w1, b1 = lin(ks[0], ks[1], in_features, H1)
    w2, b2 = lin(ks[2], ks[3], H1, H2)
    w3, b3 = lin(ks[4], ks[5], H2, 1)
    return (w1, b1, w2, b2, w3, b3)


def reference_forward(img, params):
    """Pure-JAX f32 reference mirroring the PyTorch module exactly."""
    w1, b1, w2, b2, w3, b3 = params
    x = img.reshape(img.shape[0], -1)
    h1 = _leaky_relu(x @ w1 + b1)
    h2 = _leaky_relu(h1 @ w2 + b2)
    return h2 @ w3 + b3


if __name__ == "__main__":
    # img_shape from wgan3D is not available; use a small synthetic (4, 16, 16).
    B, C, H, W = 2, 4, 16, 16
    D = C * H * W

    key = jax.random.PRNGKey(0)
    k_img, k_param = jax.random.split(key)
    img = jax.random.normal(k_img, (B, C, H, W), jnp.float32)
    params = init_params(k_param, D)

    out = wgan_discriminator(img, params)
    out = jax.block_until_ready(out)

    ref = reference_forward(img, params)
    assert out.shape == (B, 1), out.shape
    # bf16 MXU operands (f32 accumulation) -> looser tolerance vs f32 reference.
    assert jnp.allclose(out, ref, atol=3e-2, rtol=3e-2), (out, ref)

    print("KERNEL_OK")
</pallas_src>

<mosaic_0001>
module attributes {stable_mosaic.version = 11 : i64} {
  func.func @wgan_disc_kernel(%arg0: i32, %arg1: memref<8x1024xbf16, #tpu.memory_space<vmem>>, %arg2: memref<1024x512xbf16, #tpu.memory_space<vmem>>, %arg3: memref<1x512xf32, #tpu.memory_space<vmem>>, %arg4: memref<512x256xbf16, #tpu.memory_space<vmem>>, %arg5: memref<1x256xf32, #tpu.memory_space<vmem>>, %arg6: memref<1x256xf32, #tpu.memory_space<vmem>>, %arg7: memref<1xf32, #tpu.memory_space<smem>>, %arg8: memref<8x1xf32, #tpu.memory_space<vmem>>) attributes {dimension_semantics = [#tpu.dimension_semantics<parallel>], iteration_bounds = array<i64: 1>, scalar_prefetch = 0 : i64, scratch_operands = 0 : i64, tpu.core_type = #tpu.core_type<tc>, window_params = [{transform_indices = @transform_0, window_bounds = array<i64: 8, 1024>}, {pipeline_mode = #tpu.pipeline_mode<synchronous>, transform_indices = @transform_1, window_bounds = array<i64: 1024, 512>}, {pipeline_mode = #tpu.pipeline_mode<synchronous>, transform_indices = @transform_2, window_bounds = array<i64: 1, 512>}, {pipeline_mode = #tpu.pipeline_mode<synchronous>, transform_indices = @transform_3, window_bounds = array<i64: 512, 256>}, {pipeline_mode = #tpu.pipeline_mode<synchronous>, transform_indices = @transform_4, window_bounds = array<i64: 1, 256>}, {pipeline_mode = #tpu.pipeline_mode<synchronous>, transform_indices = @transform_5, window_bounds = array<i64: 1, 256>}, {transform_indices = @transform_6, window_bounds = array<i64: 1>}, {transform_indices = @transform_7, window_bounds = array<i64: 8, 1>}]} {
    %c0 = arith.constant 0 : index
    %c0_0 = arith.constant 0 : index
    %0 = vector.load %arg1[%c0, %c0_0] : memref<8x1024xbf16, #tpu.memory_space<vmem>>, vector<8x1024xbf16>
    %c0_1 = arith.constant 0 : index
    %c0_2 = arith.constant 0 : index
    %1 = vector.load %arg2[%c0_1, %c0_2] : memref<1024x512xbf16, #tpu.memory_space<vmem>>, vector<1024x512xbf16>
    %cst = arith.constant dense<0.000000e+00> : vector<8x512xf32>
    %2 = tpu.matmul %0, %1, %cst {dimension_numbers = #tpu.dot_dimension_numbers<[1], [0], [0], [1], [0, 0, 1, 1], [], []>} : vector<8x1024xbf16>, vector<1024x512xbf16>, vector<8x512xf32> -> vector<8x512xf32>
    %c0_3 = arith.constant 0 : index
    %c0_4 = arith.constant 0 : index
    %3 = vector.load %arg3[%c0_3, %c0_4] : memref<1x512xf32, #tpu.memory_space<vmem>>, vector<1x512xf32>
    %4 = vector.broadcast %3 : vector<1x512xf32> to vector<8x512xf32>
    %5 = arith.addf %2, %4 : vector<8x512xf32>
    %cst_5 = arith.constant 0.000000e+00 : f32
    %6 = vector.broadcast %cst_5 : f32 to vector<8x512xf32>
    %7 = arith.cmpf ogt, %5, %6 : vector<8x512xf32>
    %cst_6 = arith.constant 2.000000e-01 : f32
    %8 = vector.broadcast %cst_6 : f32 to vector<8x512xf32>
    %9 = arith.mulf %8, %5 : vector<8x512xf32>
    %10 = arith.select %7, %5, %9 : vector<8x512xi1>, vector<8x512xf32>
    %11 = arith.truncf %10 : vector<8x512xf32> to vector<8x512xbf16>
    %c0_7 = arith.constant 0 : index
    %c0_8 = arith.constant 0 : index
    %12 = vector.load %arg4[%c0_7, %c0_8] : memref<512x256xbf16, #tpu.memory_space<vmem>>, vector<512x256xbf16>
    %cst_9 = arith.constant dense<0.000000e+00> : vector<8x256xf32>
    %13 = tpu.matmul %11, %12, %cst_9 {dimension_numbers = #tpu.dot_dimension_numbers<[1], [0], [0], [1], [0, 0, 1, 1], [], []>} : vector<8x512xbf16>, vector<512x256xbf16>, vector<8x256xf32> -> vector<8x256xf32>
    %c0_10 = arith.constant 0 : index
    %c0_11 = arith.constant 0 : index
    %14 = vector.load %arg5[%c0_10, %c0_11] : memref<1x256xf32, #tpu.memory_space<vmem>>, vector<1x256xf32>
    %15 = vector.broadcast %14 : vector<1x256xf32> to vector<8x256xf32>
    %16 = arith.addf %13, %15 : vector<8x256xf32>
    %cst_12 = arith.constant 0.000000e+00 : f32
    %17 = vector.broadcast %cst_12 : f32 to vector<8x256xf32>
    %18 = arith.cmpf ogt, %16, %17 : vector<8x256xf32>
    %cst_13 = arith.constant 2.000000e-01 : f32
    %19 = vector.broadcast %cst_13 : f32 to vector<8x256xf32>
    %20 = arith.mulf %19, %16 : vector<8x256xf32>
    %21 = arith.select %18, %16, %20 : vector<8x256xi1>, vector<8x256xf32>
    %c0_14 = arith.constant 0 : index
    %c0_15 = arith.constant 0 : index
    %22 = vector.load %arg6[%c0_14, %c0_15] : memref<1x256xf32, #tpu.memory_space<vmem>>, vector<1x256xf32>
    %23 = vector.broadcast %22 : vector<1x256xf32> to vector<8x256xf32>
    %24 = arith.mulf %21, %23 : vector<8x256xf32>
    %cst_16 = arith.constant dense<0.000000e+00> : vector<8xf32>
    %25 = vector.multi_reduction <add>, %24, %cst_16 [1] : vector<8x256xf32> to vector<8xf32>
    %26 = vector.shape_cast %25 : vector<8xf32> to vector<8x1xf32>
    %c0_17 = arith.constant 0 : index
    %27 = memref.load %arg7[%c0_17] : memref<1xf32, #tpu.memory_space<smem>>
    %28 = vector.broadcast %27 : f32 to vector<8x1xf32>
    %29 = arith.addf %26, %28 : vector<8x1xf32>
    %c0_18 = arith.constant 0 : index
    %c0_19 = arith.constant 0 : index
    %30 = vector.load %arg8[%c0_18, %c0_19] : memref<8x1xf32, #tpu.memory_space<vmem>>, vector<8x1xf32>
    tpu.vector_store %arg8[%c0_18, %c0_19], %29 {strides = array<i32>} : memref<8x1xf32, #tpu.memory_space<vmem>>, vector<8x1xf32>,
    return
  }
  func.func @transform_0(%arg0: i32) -> (i32, i32) {
    %c0_i32 = arith.constant 0 : i32
    %c0_i32_0 = arith.constant 0 : i32
    return %arg0, %c0_i32 : i32, i32
  }
  func.func @transform_1(%arg0: i32) -> (i32, i32) {
    %c0_i32 = arith.constant 0 : i32
    %c0_i32_0 = arith.constant 0 : i32
    %c0_i32_1 = arith.constant 0 : i32
    return %c0_i32, %c0_i32_0 : i32, i32
  }
  func.func @transform_2(%arg0: i32) -> (i32, i32) {
    %c0_i32 = arith.constant 0 : i32
    %c0_i32_0 = arith.constant 0 : i32
    %c0_i32_1 = arith.constant 0 : i32
    return %c0_i32, %c0_i32_0 : i32, i32
  }
  func.func @transform_3(%arg0: i32) -> (i32, i32) {
    %c0_i32 = arith.constant 0 : i32
    %c0_i32_0 = arith.constant 0 : i32
    %c0_i32_1 = arith.constant 0 : i32
    return %c0_i32, %c0_i32_0 : i32, i32
  }
  func.func @transform_4(%arg0: i32) -> (i32, i32) {
    %c0_i32 = arith.constant 0 : i32
    %c0_i32_0 = arith.constant 0 : i32
    %c0_i32_1 = arith.constant 0 : i32
    return %c0_i32, %c0_i32_0 : i32, i32
  }
  func.func @transform_5(%arg0: i32) -> (i32, i32) {
    %c0_i32 = arith.constant 0 : i32
    %c0_i32_0 = arith.constant 0 : i32
    %c0_i32_1 = arith.constant 0 : i32
    return %c0_i32, %c0_i32_0 : i32, i32
  }
  func.func @transform_6(%arg0: i32) -> i32 {
    %c0_i32 = arith.constant 0 : i32
    %c0_i32_0 = arith.constant 0 : i32
    return %c0_i32 : i32
  }
  func.func @transform_7(%arg0: i32) -> (i32, i32) {
    %c0_i32 = arith.constant 0 : i32
    %c0_i32_0 = arith.constant 0 : i32
    return %arg0, %c0_i32 : i32, i32
  }
}

</mosaic_0001>

<bundles_post_ra>
// kernel: tpu_custom_call.1
= control target key start
LH: loop header
LB: loop body
LE: loop exit
PB: predicated region body
PF: predicated region fallthrough
CT: control target
= control target key end

     0   :  { %13 = vsyncpa [#allocation4], 0  ;;  %s3601_s0 = inlined_call_operand.hbm [shape: bf16[8,1024], index: 0, kind: input, shape index: {}]   ;;  %s3602_s1 = inlined_call_operand.hbm [shape: bf16[1024,512], index: 1, kind: input, shape index: {}]   ;;  %s3603_s2 = inlined_call_operand.vmem [shape: f32[1,512], index: 2, kind: input, shape index: {}]   ;;  %s3604_s3 = inlined_call_operand.hbm [shape: bf16[512,256], index: 3, kind: input, shape index: {}]   ;;  %s3605_s4 = inlined_call_operand.vmem [shape: f32[1,256], index: 4, kind: input, shape index: {}]   ;;  %s3606_s5 = inlined_call_operand.vmem [shape: f32[1,256], index: 5, kind: input, shape index: {}]   ;;  %s3607_s6 = inlined_call_operand.<no memory space> [shape: f32[1], index: 6, kind: input, shape index: {}]   ;;  %s3608_s7 = inlined_call_operand.vmem [shape: f32[8,1], index: 7, kind: output, shape index: {}]  }
   0x1   :  { %14 = vsyncpa [#allocation6], 0  ;;  %s3437_s24 = smov [#allocation5]   ;;  %s3367_s28 = scalar_lea.hbm %s3602_s1, 32768 }
   0x2   :  { %s30_s25 = sshll.u32 %s3437_s24, 4  ;;  %p3368_p0 = scmp.ne.s32.totalorder %s3602_s1, %s3367_s28  ;;  %s31_s25 = int_to_ptr.vmem [resolvable:$true] %s30_s25 }
   0x3   :  { %p3371_p1 = scmp.lt.u32.totalorder %s3367_s28, %s3602_s1 }
   0x5   :  { %p3373_p2 = pnand %p3371_p1, %p3368_p0 }
   0x7   :  { %3376 = shalt.err (!%p3373_p2)
}
   0x8   :  { %s3377_s10 = scalar_lea.vmem %s31_s25, 32768  ;;  %p3382_p4 = scmp.lt.s32.totalorder %s31_s25, %s31_s25 }
   0x9   :  { %p3378_p3 = scmp.ne.s32.totalorder %s31_s25, %s3377_s10  ;;  %p3383_p5 = scmp.lt.s32.totalorder %s3377_s10, %s3377_s10 }
   0xb   :  { %p3384_p6 = por %p3383_p5, %p3382_p4 }
   0xd   :  { %p3385_p7 = pnand %p3384_p6, %p3378_p3 }
   0xf   :  { %3388 = shalt.err (!%p3385_p7)
}
  0x10   :  { %s3438_s11 = smov 256   ;;  %s3439_s12 = smov 16  }
  0x11   :  { %36 = dma.hbm_to_vmem [thread:$0]  %s3602_s1, 32768, %s31_s25, [#allocation6], %s3438_s11, %s3438_s11, %s3439_s12  }
  0x12   :  { %s3440_s15 = smov [#allocation3]   ;;  %s3441_s17 = smov [#allocation7]  }
  0x13   :  { %s21_s16 = sshll.u32 %s3440_s15, 4  ;;  %s44_s18 = sshll.u32 %s3441_s17, 4  ;;  %s22_s16 = int_to_ptr.vmem [resolvable:$true] %s21_s16  ;;  %s45_s18 = int_to_ptr.vmem [resolvable:$true] %s44_s18 }
  0x14   :  { %s3389_s21 = scalar_lea.hbm %s3601_s0, 512 }
  0x15   :  { %p3390_p8 = scmp.ne.s32.totalorder %s3601_s0, %s3389_s21  ;;  %p3393_p9 = scmp.lt.u32.totalorder %s3389_s21, %s3601_s0 }
  0x17   :  { %p3395_p10 = pnand %p3393_p9, %p3390_p8 }
  0x19   :  { %3398 = shalt.err (!%p3395_p10)
}
  0x1a   :  { %s3399_s1 = scalar_lea.vmem %s22_s16, 512  ;;  %p3404_p12 = scmp.lt.s32.totalorder %s22_s16, %s22_s16 }
  0x1b   :  { %p3400_p11 = scmp.ne.s32.totalorder %s22_s16, %s3399_s1  ;;  %p3405_p13 = scmp.lt.s32.totalorder %s3399_s1, %s3399_s1 }
  0x1d   :  { %p3406_p0 = por %p3405_p13, %p3404_p12 }
  0x1f   :  { %p3407_p1 = pnand %p3406_p0, %p3400_p11 }
  0x21   :  { %3410 = shalt.err (!%p3407_p1)
}
  0x22   :  { %24 = dma.hbm_to_vmem [thread:$0]  %s3601_s0, 512, %s22_s16, [#allocation4]  }
  0x23   :  { %s3411_s30 = scalar_lea.hbm %s3604_s3, 8192 }
  0x24   :  { %p3412_p2 = scmp.ne.s32.totalorder %s3604_s3, %s3411_s30  ;;  %p3415_p3 = scmp.lt.u32.totalorder %s3411_s30, %s3604_s3 }
  0x26   :  { %p3417_p4 = pnand %p3415_p3, %p3412_p2 }
  0x28   :  { %3420 = shalt.err (!%p3417_p4)
}
  0x29   :  { %s3421_s12 = scalar_lea.vmem %s45_s18, 8192  ;;  %p3426_p6 = scmp.lt.s32.totalorder %s45_s18, %s45_s18 }
  0x2a   :  { %p3422_p5 = scmp.ne.s32.totalorder %s45_s18, %s3421_s12  ;;  %p3427_p7 = scmp.lt.s32.totalorder %s3421_s12, %s3421_s12 }
  0x2c   :  { %p3428_p8 = por %p3427_p7, %p3426_p6 }
  0x2e   :  { %p3429_p9 = pnand %p3428_p8, %p3422_p5 }
  0x30   :  { %3432 = shalt.err (!%p3429_p9)
}
  0x31   :  { %s3442_s0 = smov 128   ;;  %s3443_s13 = smov 8  }
  0x32   :  { %50 = dma.hbm_to_vmem [thread:$0]  %s3604_s3, 8192, %s45_s18, [#allocation6], %s3442_s0, %s3442_s0, %s3443_s13  }
  0x33   :  { %3433 = dma.done.wait [#allocation4], 512  }
  0x34   :  { %3434 = vsyncadd [#allocation4], 4294966784 }
  0x35   :  { %3435 = dma.done.wait [#allocation6], 40960  }
  0x36   :  { %3436 = vsyncadd [#allocation6], 4294926336  ;;  %v2879_v0 = vld [vmem:[#allocation5 + $0x4] ss:$16 sps:$4 sm:$0xff]   ;;  %v2883_v2 = vld [vmem:[#allocation5] ss:$16 sps:$4 sm:$0xff]  }
  0x37   :  { %v2881_v1 = vld [vmem:[#allocation5 + $0x204] ss:$16 sps:$4 sm:$0xff]   ;;  %1656 = vmatprep.subr.bf16.mxu1 %v2879_v0  ;;  %v2884_v3 = vld [vmem:[#allocation5 + $0x200] ss:$16 sps:$4 sm:$0xff]   ;;  %v67_v48 = vld [vmem:[#allocation3 + $0x8] sm:$0xff]  ;;  %vm2504_vm6 = vcmask 7168  }
  0x38   :  { %1697 = vmatprep.subr.bf16.mxu0 %v2881_v1  ;;  %v2885_v4 = vld [vmem:[#allocation5 + $0x24] ss:$16 sps:$4 sm:$0xff]   ;;  %1657 = vmatpush1.bf16.msra.mxu1 %v2883_v2  ;;  %v2889_v6 = vld [vmem:[#allocation5 + $0x20] ss:$16 sps:$4 sm:$0xff]   ;;  %v3522_v51 = vcombine.high %v67_v48, %v67_v48 }
  0x39   :  { %1698 = vmatpush1.bf16.msra.mxu0 %v2884_v3  ;;  %v2887_v5 = vld [vmem:[#allocation5 + $0x224] ss:$16 sps:$4 sm:$0xff]   ;;  %1658 = vmatprep.subr.bf16.mxu1 %v2885_v4  ;;  %v2890_v7 = vld [vmem:[#allocation5 + $0x220] ss:$16 sps:$4 sm:$0xff]  }
  0x3a   :  { %1699 = vmatprep.subr.bf16.mxu0 %v2887_v5  ;;  %v2891_v8 = vld [vmem:[#allocation5 + $0x44] ss:$16 sps:$4 sm:$0xff]   ;;  %v2895_v10 = vld [vmem:[#allocation5 + $0x40] ss:$16 sps:$4 sm:$0xff]   ;;  %1729 = vmatprep.mubr.bf16.mxu0 %v3522_v51  ;;  %v2984_v5 = vld [vmem:[#allocation5 + $0xc] ss:$16 sps:$4 sm:$0xff]  }
  0x3b   :  { %v2893_v9 = vld [vmem:[#allocation5 + $0x244] ss:$16 sps:$4 sm:$0xff]   ;;  %v2896_v11 = vld [vmem:[#allocation5 + $0x240] ss:$16 sps:$4 sm:$0xff]  }
  0x3c   :  { %1659 = vmatpush1.bf16.msra.mxu1 %v2889_v6  ;;  %v2897_v12 = vld [vmem:[#allocation5 + $0x64] ss:$16 sps:$4 sm:$0xff]   ;;  %v2901_v14 = vld [vmem:[#allocation5 + $0x60] ss:$16 sps:$4 sm:$0xff]  }
  0x3d   :  { %1700 = vmatpush1.bf16.msra.mxu0 %v2890_v7  ;;  %1660 = vmatprep.subr.bf16.mxu1 %v2891_v8  ;;  %v2899_v13 = vld [vmem:[#allocation5 + $0x264] ss:$16 sps:$4 sm:$0xff]   ;;  %v2902_v15 = vld [vmem:[#allocation5 + $0x260] ss:$16 sps:$4 sm:$0xff]   ;;  %v3528_v7 = vcombine.low %v67_v48, %v67_v48 }
  0x3e   :  { %1701 = vmatprep.subr.bf16.mxu0 %v2893_v9  ;;  %v2903_v16 = vld [vmem:[#allocation5 + $0x84] ss:$16 sps:$4 sm:$0xff]   ;;  %v2907_v18 = vld [vmem:[#allocation5 + $0x80] ss:$16 sps:$4 sm:$0xff]   ;;  %v2982_v9 = vld [vmem:[#allocation5 + $0x8] ss:$16 sps:$4 sm:$0xff]  }
  0x3f   :  { %v2905_v17 = vld [vmem:[#allocation5 + $0x284] ss:$16 sps:$4 sm:$0xff]   ;;  %v2908_v19 = vld [vmem:[#allocation5 + $0x280] ss:$16 sps:$4 sm:$0xff]  }
  0x40   :  { %1661 = vmatpush1.bf16.msra.mxu1 %v2895_v10  ;;  %v2909_v20 = vld [vmem:[#allocation5 + $0xa4] ss:$16 sps:$4 sm:$0xff]   ;;  %v2913_v22 = vld [vmem:[#allocation5 + $0xa0] ss:$16 sps:$4 sm:$0xff]  }
  0x41   :  { %1702 = vmatpush1.bf16.msra.mxu0 %v2896_v11  ;;  %1662 = vmatprep.subr.bf16.mxu1 %v2897_v12  ;;  %v2911_v21 = vld [vmem:[#allocation5 + $0x2a4] ss:$16 sps:$4 sm:$0xff]   ;;  %v2914_v23 = vld [vmem:[#allocation5 + $0x2a0] ss:$16 sps:$4 sm:$0xff]   ;;  %v2990_v11 = vld [vmem:[#allocation5 + $0x2c] ss:$16 sps:$4 sm:$0xff]  }
  0x42   :  { %1703 = vmatprep.subr.bf16.mxu0 %v2899_v13  ;;  %v2915_v24 = vld [vmem:[#allocation5 + $0xc4] ss:$16 sps:$4 sm:$0xff]   ;;  %v2919_v26 = vld [vmem:[#allocation5 + $0xc0] ss:$16 sps:$4 sm:$0xff]   ;;  %v2988_v13 = vld [vmem:[#allocation5 + $0x28] ss:$16 sps:$4 sm:$0xff]  }
  0x43   :  { %v2917_v25 = vld [vmem:[#allocation5 + $0x2c4] ss:$16 sps:$4 sm:$0xff]   ;;  %v2920_v27 = vld [vmem:[#allocation5 + $0x2c0] ss:$16 sps:$4 sm:$0xff]  }
  0x44   :  { %1663 = vmatpush1.bf16.msra.mxu1 %v2901_v14  ;;  %v2921_v28 = vld [vmem:[#allocation5 + $0xe4] ss:$16 sps:$4 sm:$0xff]   ;;  %v2925_v30 = vld [vmem:[#allocation5 + $0xe0] ss:$16 sps:$4 sm:$0xff]  }
  0x45   :  { %1704 = vmatpush1.bf16.msra.mxu0 %v2902_v15  ;;  %1664 = vmatprep.subr.bf16.mxu1 %v2903_v16  ;;  %v2923_v29 = vld [vmem:[#allocation5 + $0x2e4] ss:$16 sps:$4 sm:$0xff]   ;;  %v2926_v31 = vld [vmem:[#allocation5 + $0x2e0] ss:$16 sps:$4 sm:$0xff]   ;;  %v2996_v15 = vld [vmem:[#allocation5 + $0x4c] ss:$16 sps:$4 sm:$0xff]  }
  0x46   :  { %1705 = vmatprep.subr.bf16.mxu0 %v2905_v17  ;;  %v2927_v32 = vld [vmem:[#allocation5 + $0x104] ss:$16 sps:$4 sm:$0xff]   ;;  %v2931_v34 = vld [vmem:[#allocation5 + $0x100] ss:$16 sps:$4 sm:$0xff]   ;;  %v2994_v17 = vld [vmem:[#allocation5 + $0x48] ss:$16 sps:$4 sm:$0xff]  }
  0x47   :  { %v2929_v33 = vld [vmem:[#allocation5 + $0x304] ss:$16 sps:$4 sm:$0xff]   ;;  %v2932_v35 = vld [vmem:[#allocation5 + $0x300] ss:$16 sps:$4 sm:$0xff]  }
  0x48   :  { %1665 = vmatpush1.bf16.msra.mxu1 %v2907_v18  ;;  %v2933_v36 = vld [vmem:[#allocation5 + $0x124] ss:$16 sps:$4 sm:$0xff]   ;;  %v2937_v38 = vld [vmem:[#allocation5 + $0x120] ss:$16 sps:$4 sm:$0xff]  }
  0x49   :  { %1706 = vmatpush1.bf16.msra.mxu0 %v2908_v19  ;;  %1666 = vmatprep.subr.bf16.mxu1 %v2909_v20  ;;  %v2935_v37 = vld [vmem:[#allocation5 + $0x324] ss:$16 sps:$4 sm:$0xff]   ;;  %v2938_v39 = vld [vmem:[#allocation5 + $0x320] ss:$16 sps:$4 sm:$0xff]   ;;  %v3002_v19 = vld [vmem:[#allocation5 + $0x6c] ss:$16 sps:$4 sm:$0xff]  }
  0x4a   :  { %1707 = vmatprep.subr.bf16.mxu0 %v2911_v21  ;;  %v2939_v40 = vld [vmem:[#allocation5 + $0x144] ss:$16 sps:$4 sm:$0xff]   ;;  %v2943_v42 = vld [vmem:[#allocation5 + $0x140] ss:$16 sps:$4 sm:$0xff]   ;;  %v3000_v21 = vld [vmem:[#allocation5 + $0x68] ss:$16 sps:$4 sm:$0xff]  }
  0x4b   :  { %v2941_v41 = vld [vmem:[#allocation5 + $0x344] ss:$16 sps:$4 sm:$0xff]   ;;  %v2944_v43 = vld [vmem:[#allocation5 + $0x340] ss:$16 sps:$4 sm:$0xff]  }
  0x4c   :  { %1667 = vmatpush1.bf16.msra.mxu1 %v2913_v22  ;;  %v2945_v44 = vld [vmem:[#allocation5 + $0x164] ss:$16 sps:$4 sm:$0xff]   ;;  %v2949_v49 = vld [vmem:[#allocation5 + $0x160] ss:$16 sps:$4 sm:$0xff]  }
  0x4d   :  { %1708 = vmatpush1.bf16.msra.mxu0 %v2914_v23  ;;  %1668 = vmatprep.subr.bf16.mxu1 %v2915_v24  ;;  %v2947_v45 = vld [vmem:[#allocation5 + $0x364] ss:$16 sps:$4 sm:$0xff]   ;;  %v2950_v50 = vld [vmem:[#allocation5 + $0x360] ss:$16 sps:$4 sm:$0xff]   ;;  %v3008_v23 = vld [vmem:[#allocation5 + $0x8c] ss:$16 sps:$4 sm:$0xff]  }
  0x4e   :  { %1709 = vmatprep.subr.bf16.mxu0 %v2917_v25  ;;  %v66_v46 = vld [vmem:[#allocation3] sm:$0xff]  ;;  %v3006_v25 = vld [vmem:[#allocation5 + $0x88] ss:$16 sps:$4 sm:$0xff]  }
  0x4f   :  { %v3520_v47 = vcombine.high %v66_v46, %v66_v46  ;;  %v2951_v52 = vld [vmem:[#allocation5 + $0x184] ss:$16 sps:$4 sm:$0xff]   ;;  %v2955_v54 = vld [vmem:[#allocation5 + $0x180] ss:$16 sps:$4 sm:$0xff]   ;;  %v3526_v6 = vcombine.low %v66_v46, %v66_v46 }
  0x50   :  { %1669 = vmatpush1.bf16.msra.mxu1 %v2919_v26  ;;  %v2953_v53 = vld [vmem:[#allocation5 + $0x384] ss:$16 sps:$4 sm:$0xff]   ;;  %v2956_v55 = vld [vmem:[#allocation5 + $0x380] ss:$16 sps:$4 sm:$0xff]  }
  0x51   :  { %1710 = vmatpush1.bf16.msra.mxu0 %v2920_v27  ;;  %1670 = vmatprep.subr.bf16.mxu1 %v2921_v28  ;;  %v2957_v56 = vld [vmem:[#allocation5 + $0x1a4] ss:$16 sps:$4 sm:$0xff]   ;;  %v2961_v58 = vld [vmem:[#allocation5 + $0x1a0] ss:$16 sps:$4 sm:$0xff]   ;;  %v3014_v27 = vld [vmem:[#allocation5 + $0xac] ss:$16 sps:$4 sm:$0xff]  }
  0x52   :  { %1711 = vmatprep.subr.bf16.mxu0 %v2923_v29  ;;  %1688 = vmatprep.mubr.bf16.mxu1 %v3520_v47  ;;  %v2959_v57 = vld [vmem:[#allocation5 + $0x3a4] ss:$16 sps:$4 sm:$0xff]   ;;  %v2962_v59 = vld [vmem:[#allocation5 + $0x3a0] ss:$16 sps:$4 sm:$0xff]   ;;  %v3012_v29 = vld [vmem:[#allocation5 + $0xa8] ss:$16 sps:$4 sm:$0xff]  }
  0x53   :  { %v2963_v60 = vld [vmem:[#allocation5 + $0x1c4] ss:$16 sps:$4 sm:$0xff]   ;;  %v2967_v62 = vld [vmem:[#allocation5 + $0x1c0] ss:$16 sps:$4 sm:$0xff]  }
  0x54   :  { %1671 = vmatpush1.bf16.msra.mxu1 %v2925_v30  ;;  %v2965_v61 = vld [vmem:[#allocation5 + $0x3c4] ss:$16 sps:$4 sm:$0xff]   ;;  %v2968_v63 = vld [vmem:[#allocation5 + $0x3c0] ss:$16 sps:$4 sm:$0xff]  }
  0x55   :  { %1712 = vmatpush1.bf16.msra.mxu0 %v2926_v31  ;;  %1672 = vmatprep.subr.bf16.mxu1 %v2927_v32  ;;  %v2969_v0 = vld [vmem:[#allocation5 + $0x1e4] ss:$16 sps:$4 sm:$0xff]   ;;  %v2973_v2 = vld [vmem:[#allocation5 + $0x1e0] ss:$16 sps:$4 sm:$0xff]   ;;  %v3020_v31 = vld [vmem:[#allocation5 + $0xcc] ss:$16 sps:$4 sm:$0xff]  }
  0x56   :  { %1713 = vmatprep.subr.bf16.mxu0 %v2929_v33  ;;  %v2971_v1 = vld [vmem:[#allocation5 + $0x3e4] ss:$16 sps:$4 sm:$0xff]   ;;  %v2974_v3 = vld [vmem:[#allocation5 + $0x3e0] ss:$16 sps:$4 sm:$0xff]  }
  0x57   :  { %v2981_v4 = vld [vmem:[#allocation5 + $0x404] ss:$16 sps:$4 sm:$0xff]   ;;  %v2979_v8 = vld [vmem:[#allocation5 + $0x400] ss:$16 sps:$4 sm:$0xff]  }
  0x58   :  { %1673 = vmatpush1.bf16.msra.mxu1 %v2931_v34  ;;  %v2987_v10 = vld [vmem:[#allocation5 + $0x424] ss:$16 sps:$4 sm:$0xff]   ;;  %v2985_v12 = vld [vmem:[#allocation5 + $0x420] ss:$16 sps:$4 sm:$0xff]  }
  0x59   :  { %1714 = vmatpush1.bf16.msra.mxu0 %v2932_v35  ;;  %1674 = vmatprep.subr.bf16.mxu1 %v2933_v36  ;;  %v2993_v14 = vld [vmem:[#allocation5 + $0x444] ss:$16 sps:$4 sm:$0xff]   ;;  %v2991_v16 = vld [vmem:[#allocation5 + $0x440] ss:$16 sps:$4 sm:$0xff]   ;;  %v3018_v35 = vld [vmem:[#allocation5 + $0xc8] ss:$16 sps:$4 sm:$0xff]  }
  0x5a   :  { %1715 = vmatprep.subr.bf16.mxu0 %v2935_v37  ;;  %v2999_v18 = vld [vmem:[#allocation5 + $0x464] ss:$16 sps:$4 sm:$0xff]   ;;  %v2997_v20 = vld [vmem:[#allocation5 + $0x460] ss:$16 sps:$4 sm:$0xff]   ;;  %v3026_v37 = vld [vmem:[#allocation5 + $0xec] ss:$16 sps:$4 sm:$0xff]  }
  0x5b   :  { %v3005_v22 = vld [vmem:[#allocation5 + $0x484] ss:$16 sps:$4 sm:$0xff]   ;;  %v3003_v24 = vld [vmem:[#allocation5 + $0x480] ss:$16 sps:$4 sm:$0xff]  }
  0x5c   :  { %1675 = vmatpush1.bf16.msra.mxu1 %v2937_v38  ;;  %v3011_v26 = vld [vmem:[#allocation5 + $0x4a4] ss:$16 sps:$4 sm:$0xff]   ;;  %v3009_v28 = vld [vmem:[#allocation5 + $0x4a0] ss:$16 sps:$4 sm:$0xff]  }
  0x5d   :  { %1716 = vmatpush1.bf16.msra.mxu0 %v2938_v39  ;;  %1676 = vmatprep.subr.bf16.mxu1 %v2939_v40  ;;  %v3017_v30 = vld [vmem:[#allocation5 + $0x4c4] ss:$16 sps:$4 sm:$0xff]   ;;  %v3015_v33 = vld [vmem:[#allocation5 + $0x4c0] ss:$16 sps:$4 sm:$0xff]   ;;  %v3024_v39 = vld [vmem:[#allocation5 + $0xe8] ss:$16 sps:$4 sm:$0xff]  }
  0x5e   :  { %1717 = vmatprep.subr.bf16.mxu0 %v2941_v41  ;;  %v3533_v32 = vld [vmem:[#allocation3 + $0x10] sm:$0xff]  ;;  %v3032_v41 = vld [vmem:[#allocation5 + $0x10c] ss:$16 sps:$4 sm:$0xff]  }
  0x5f   :  { %v3537_v34 = vcombine.high %v3533_v32, %v3533_v32  ;;  %v3023_v36 = vld [vmem:[#allocation5 + $0x4e4] ss:$16 sps:$4 sm:$0xff]   ;;  %v3021_v38 = vld [vmem:[#allocation5 + $0x4e0] ss:$16 sps:$4 sm:$0xff]  }
  0x60   :  { %1677 = vmatpush1.bf16.msra.mxu1 %v2943_v42  ;;  %v3029_v40 = vld [vmem:[#allocation5 + $0x504] ss:$16 sps:$4 sm:$0xff]   ;;  %v3027_v42 = vld [vmem:[#allocation5 + $0x500] ss:$16 sps:$4 sm:$0xff]  }
  0x61   :  { %1718 = vmatpush1.bf16.msra.mxu0 %v2944_v43  ;;  %1678 = vmatprep.subr.bf16.mxu1 %v2945_v44  ;;  %v3030_v43 = vld [vmem:[#allocation5 + $0x108] ss:$16 sps:$4 sm:$0xff]   ;;  %v3035_v44 = vld [vmem:[#allocation5 + $0x524] ss:$16 sps:$4 sm:$0xff]   ;;  %v3033_v46 = vld [vmem:[#allocation5 + $0x520] ss:$16 sps:$4 sm:$0xff]  }
  0x62   :  { %1719 = vmatprep.subr.bf16.mxu0 %v2947_v45  ;;  %v3038_v45 = vld [vmem:[#allocation5 + $0x12c] ss:$16 sps:$4 sm:$0xff]   ;;  %v3041_v48 = vld [vmem:[#allocation5 + $0x544] ss:$16 sps:$4 sm:$0xff]  }
  0x64   :  { %1679 = vmatpush1.bf16.msra.mxu1 %v2949_v49  ;;  %v3044_v49 = vld [vmem:[#allocation5 + $0x14c] ss:$16 sps:$4 sm:$0xff]  }
  0x65   :  { %1720 = vmatpush1.bf16.msra.mxu0 %v2950_v50  ;;  %1680 = vmatprep.subr.bf16.mxu1 %v2951_v52  ;;  %v3039_v50 = vld [vmem:[#allocation5 + $0x540] ss:$16 sps:$4 sm:$0xff]   ;;  %v3042_v52 = vld [vmem:[#allocation5 + $0x148] ss:$16 sps:$4 sm:$0xff]  }
  0x66   :  { %1721 = vmatprep.subr.bf16.mxu0 %v2953_v53  ;;  %v3047_v53 = vld [vmem:[#allocation5 + $0x564] ss:$16 sps:$4 sm:$0xff]  }
  0x68   :  { %1681 = vmatpush1.bf16.msra.mxu1 %v2955_v54  ;;  %v3050_v54 = vld [vmem:[#allocation5 + $0x16c] ss:$16 sps:$4 sm:$0xff]  }
  0x69   :  { %1722 = vmatpush1.bf16.msra.mxu0 %v2956_v55  ;;  %1682 = vmatprep.subr.bf16.mxu1 %v2957_v56  ;;  %v3045_v55 = vld [vmem:[#allocation5 + $0x560] ss:$16 sps:$4 sm:$0xff]   ;;  %v3048_v56 = vld [vmem:[#allocation5 + $0x168] ss:$16 sps:$4 sm:$0xff]  }
  0x6a   :  { %1723 = vmatprep.subr.bf16.mxu0 %v2959_v57  ;;  %v3053_v57 = vld [vmem:[#allocation5 + $0x584] ss:$16 sps:$4 sm:$0xff]  }
  0x6c   :  { %1683 = vmatpush1.bf16.msra.mxu1 %v2961_v58  ;;  %v3056_v58 = vld [vmem:[#allocation5 + $0x18c] ss:$16 sps:$4 sm:$0xff]  }
  0x6d   :  { %1724 = vmatpush1.bf16.msra.mxu0 %v2962_v59  ;;  %1684 = vmatprep.subr.bf16.mxu1 %v2963_v60  ;;  %v3051_v59 = vld [vmem:[#allocation5 + $0x580] ss:$16 sps:$4 sm:$0xff]   ;;  %v3054_v60 = vld [vmem:[#allocation5 + $0x188] ss:$16 sps:$4 sm:$0xff]  }
  0x6e   :  { %1725 = vmatprep.subr.bf16.mxu0 %v2965_v61  ;;  %v3059_v61 = vld [vmem:[#allocation5 + $0x5a4] ss:$16 sps:$4 sm:$0xff]  }
  0x70   :  { %1685 = vmatpush1.bf16.msra.mxu1 %v2967_v62  ;;  %v3062_v62 = vld [vmem:[#allocation5 + $0x1ac] ss:$16 sps:$4 sm:$0xff]  }
  0x71   :  { %1726 = vmatpush1.bf16.msra.mxu0 %v2968_v63  ;;  %1686 = vmatprep.subr.bf16.mxu1 %v2969_v0  ;;  %v3057_v63 = vld [vmem:[#allocation5 + $0x5a0] ss:$16 sps:$4 sm:$0xff]   ;;  %v3060_v0 = vld [vmem:[#allocation5 + $0x1a8] ss:$16 sps:$4 sm:$0xff]  }
  0x72   :  { %1727 = vmatprep.subr.bf16.mxu0 %v2971_v1  ;;  %v3065_v1 = vld [vmem:[#allocation5 + $0x5c4] ss:$16 sps:$4 sm:$0xff]  }
  0x74   :  { %1687 = vmatpush1.bf16.msra.mxu1 %v2973_v2  ;;  %v3068_v2 = vld [vmem:[#allocation5 + $0x1cc] ss:$16 sps:$4 sm:$0xff]  }
  0x75   :  { %1728 = vmatpush1.bf16.msra.mxu0 %v2974_v3  ;;  %1820 = vmatprep.subr.bf16.mxu1 %v2984_v5  ;;  %v3063_v3 = vld [vmem:[#allocation5 + $0x5c0] ss:$16 sps:$4 sm:$0xff]   ;;  %v3071_v5 = vld [vmem:[#allocation5 + $0x5e4] ss:$16 sps:$4 sm:$0xff]  }
  0x76   :  { %1738 = vmatprep.subr.bf16.mxu0 %v2981_v4  ;;  %v3066_v4 = vld [vmem:[#allocation5 + $0x1c8] ss:$16 sps:$4 sm:$0xff]  }
  0x77   :  { %1689 = vmatmul.mubr.bf16.vlgmr.msra.gmra.mrb[0].mxu1 %v3526_v6 }
  0x78   :  { %1730 = vmatmul.mubr.bf16.vlgmr.msra.gmra.mrb[0].mxu0 %v3528_v7  ;;  %1821 = vmatpush1.bf16.msra.mxu1 %v2982_v9  ;;  %v3069_v9 = vld [vmem:[#allocation5 + $0x5e0] ss:$16 sps:$4 sm:$0xff]  }
  0x79   :  { %1739 = vmatpush1.bf16.msra.mxu0 %v2979_v8  ;;  %1822 = vmatprep.subr.bf16.mxu1 %v2990_v11  ;;  %v3074_v8 = vld [vmem:[#allocation5 + $0x1ec] ss:$16 sps:$4 sm:$0xff]   ;;  %v3079_v11 = vld [vmem:[#allocation5 + $0x604] ss:$16 sps:$4 sm:$0xff]  }
  0x7a   :  { %1740 = vmatprep.subr.bf16.mxu0 %v2987_v10  ;;  %1852 = vmatprep.mubr.bf16.mxu1 %v3520_v47  ;;  %v3036_v47 = vld [vmem:[#allocation5 + $0x128] ss:$16 sps:$4 sm:$0xff]  }
  0x7b   :  { %1770 = vmatprep.mubr.bf16.mxu0 %v3537_v34  ;;  %v3072_v10 = vld [vmem:[#allocation5 + $0x1e8] ss:$16 sps:$4 sm:$0xff]  }
  0x7c   :  { %1823 = vmatpush1.bf16.msra.mxu1 %v2988_v13  ;;  %v3542_v13 = vcombine.low %v3533_v32, %v3533_v32  ;;  %v3104_v32 = vld [vmem:[#allocation5 + $0x288] ss:$16 sps:$4 sm:$0xff]  }
  0x7d   :  { %1741 = vmatpush1.bf16.msra.mxu0 %v2985_v12  ;;  %1824 = vmatprep.subr.bf16.mxu1 %v2996_v15  ;;  %v3082_v12 = vld [vmem:[#allocation5 + $0x20c] ss:$16 sps:$4 sm:$0xff]   ;;  %v3080_v15 = vld [vmem:[#allocation5 + $0x208] ss:$16 sps:$4 sm:$0xff]  }
  0x7e   :  { %1742 = vmatprep.subr.bf16.mxu0 %v2993_v14  ;;  %v3077_v14 = vld [vmem:[#allocation5 + $0x600] ss:$16 sps:$4 sm:$0xff]  }
  0x80   :  { %1825 = vmatpush1.bf16.msra.mxu1 %v2994_v17  ;;  %v3088_v17 = vld [vmem:[#allocation5 + $0x22c] ss:$16 sps:$4 sm:$0xff]  }
  0x81   :  { %1743 = vmatpush1.bf16.msra.mxu0 %v2991_v16  ;;  %1826 = vmatprep.subr.bf16.mxu1 %v3002_v19  ;;  %v3085_v16 = vld [vmem:[#allocation5 + $0x624] ss:$16 sps:$4 sm:$0xff]  }
  0x82   :  { %1744 = vmatprep.subr.bf16.mxu0 %v2999_v18  ;;  %v3544_v18 = vld [vmem:[#allocation3 + $0x18] sm:$0xff] }
  0x83   :  { %v3548_v19 = vcombine.high %v3544_v18, %v3544_v18 }
  0x84   :  { %1827 = vmatpush1.bf16.msra.mxu1 %v3000_v21  ;;  %v3086_v21 = vld [vmem:[#allocation5 + $0x228] ss:$16 sps:$4 sm:$0xff]  }
  0x85   :  { %1745 = vmatpush1.bf16.msra.mxu0 %v2997_v20  ;;  %1828 = vmatprep.subr.bf16.mxu1 %v3008_v23  ;;  %v3083_v20 = vld [vmem:[#allocation5 + $0x620] ss:$16 sps:$4 sm:$0xff]   ;;  %v3094_v23 = vld [vmem:[#allocation5 + $0x24c] ss:$16 sps:$4 sm:$0xff]  }
  0x86   :  { %1746 = vmatprep.subr.bf16.mxu0 %v3005_v22  ;;  %v3091_v22 = vld [vmem:[#allocation5 + $0x644] ss:$16 sps:$4 sm:$0xff]  }
  0x88   :  { %1829 = vmatpush1.bf16.msra.mxu1 %v3006_v25  ;;  %v3092_v25 = vld [vmem:[#allocation5 + $0x248] ss:$16 sps:$4 sm:$0xff]  }
  0x89   :  { %1747 = vmatpush1.bf16.msra.mxu0 %v3003_v24  ;;  %1830 = vmatprep.subr.bf16.mxu1 %v3014_v27  ;;  %v3089_v24 = vld [vmem:[#allocation5 + $0x640] ss:$16 sps:$4 sm:$0xff]  }
  0x8a   :  { %1748 = vmatprep.subr.bf16.mxu0 %v3011_v26  ;;  %v3097_v26 = vld [vmem:[#allocation5 + $0x664] ss:$16 sps:$4 sm:$0xff]   ;;  %v3095_v27 = vld [vmem:[#allocation5 + $0x660] ss:$16 sps:$4 sm:$0xff]  }
  0x8c   :  { %1831 = vmatpush1.bf16.msra.mxu1 %v3012_v29  ;;  %v3103_v29 = vld [vmem:[#allocation5 + $0x684] ss:$16 sps:$4 sm:$0xff]  }
  0x8d   :  { %1749 = vmatpush1.bf16.msra.mxu0 %v3009_v28  ;;  %1832 = vmatprep.subr.bf16.mxu1 %v3020_v31  ;;  %v3098_v28 = vld [vmem:[#allocation5 + $0x268] ss:$16 sps:$4 sm:$0xff]   ;;  %v3101_v31 = vld [vmem:[#allocation5 + $0x680] ss:$16 sps:$4 sm:$0xff]  }
  0x8e   :  { %1750 = vmatprep.subr.bf16.mxu0 %v3017_v30  ;;  %v3106_v30 = vld [vmem:[#allocation5 + $0x28c] ss:$16 sps:$4 sm:$0xff]  }
  0x90   :  { %1833 = vmatpush1.bf16.msra.mxu1 %v3018_v35  ;;  %v3107_v35 = vld [vmem:[#allocation5 + $0x6a0] ss:$16 sps:$4 sm:$0xff]  }
  0x91   :  { %1751 = vmatpush1.bf16.msra.mxu0 %v3015_v33  ;;  %1834 = vmatprep.subr.bf16.mxu1 %v3026_v37  ;;  %v3112_v33 = vld [vmem:[#allocation5 + $0x2ac] ss:$16 sps:$4 sm:$0xff]   ;;  %v3115_v37 = vld [vmem:[#allocation5 + $0x6c4] ss:$16 sps:$4 sm:$0xff]  }
  0x92   :  { %1752 = vmatprep.subr.bf16.mxu0 %v3023_v36  ;;  %v3110_v36 = vld [vmem:[#allocation5 + $0x2a8] ss:$16 sps:$4 sm:$0xff]  }
  0x94   :  { %1835 = vmatpush1.bf16.msra.mxu1 %v3024_v39  ;;  %v3113_v39 = vld [vmem:[#allocation5 + $0x6c0] ss:$16 sps:$4 sm:$0xff]  }
  0x95   :  { %1753 = vmatpush1.bf16.msra.mxu0 %v3021_v38  ;;  %1836 = vmatprep.subr.bf16.mxu1 %v3032_v41  ;;  %v3118_v38 = vld [vmem:[#allocation5 + $0x2cc] ss:$16 sps:$4 sm:$0xff]   ;;  %v3121_v41 = vld [vmem:[#allocation5 + $0x6e4] ss:$16 sps:$4 sm:$0xff]  }
  0x96   :  { %1754 = vmatprep.subr.bf16.mxu0 %v3029_v40  ;;  %v3116_v40 = vld [vmem:[#allocation5 + $0x2c8] ss:$16 sps:$4 sm:$0xff]  }
  0x98   :  { %1837 = vmatpush1.bf16.msra.mxu1 %v3030_v43  ;;  %v3119_v43 = vld [vmem:[#allocation5 + $0x6e0] ss:$16 sps:$4 sm:$0xff]  }
  0x99   :  { %1755 = vmatpush1.bf16.msra.mxu0 %v3027_v42  ;;  %1838 = vmatprep.subr.bf16.mxu1 %v3038_v45  ;;  %v3124_v42 = vld [vmem:[#allocation5 + $0x2ec] ss:$16 sps:$4 sm:$0xff]   ;;  %v3127_v45 = vld [vmem:[#allocation5 + $0x704] ss:$16 sps:$4 sm:$0xff]  }
  0x9a   :  { %1756 = vmatprep.subr.bf16.mxu0 %v3035_v44  ;;  %v3122_v44 = vld [vmem:[#allocation5 + $0x2e8] ss:$16 sps:$4 sm:$0xff]  }
  0x9c   :  { %1839 = vmatpush1.bf16.msra.mxu1 %v3036_v47  ;;  %v3125_v47 = vld [vmem:[#allocation5 + $0x700] ss:$16 sps:$4 sm:$0xff]  }
  0x9d   :  { %1757 = vmatpush1.bf16.msra.mxu0 %v3033_v46  ;;  %1840 = vmatprep.subr.bf16.mxu1 %v3044_v49  ;;  %v3130_v46 = vld [vmem:[#allocation5 + $0x30c] ss:$16 sps:$4 sm:$0xff]   ;;  %v3133_v49 = vld [vmem:[#allocation5 + $0x724] ss:$16 sps:$4 sm:$0xff]  }
  0x9e   :  { %1758 = vmatprep.subr.bf16.mxu0 %v3041_v48  ;;  %v3128_v48 = vld [vmem:[#allocation5 + $0x308] ss:$16 sps:$4 sm:$0xff]  }
  0xa0   :  { %1841 = vmatpush1.bf16.msra.mxu1 %v3042_v52  ;;  %v3131_v52 = vld [vmem:[#allocation5 + $0x720] ss:$16 sps:$4 sm:$0xff]  }
  0xa1   :  { %1759 = vmatpush1.bf16.msra.mxu0 %v3039_v50  ;;  %1842 = vmatprep.subr.bf16.mxu1 %v3050_v54  ;;  %v3136_v50 = vld [vmem:[#allocation5 + $0x32c] ss:$16 sps:$4 sm:$0xff]   ;;  %v3139_v54 = vld [vmem:[#allocation5 + $0x744] ss:$16 sps:$4 sm:$0xff]  }
  0xa2   :  { %1760 = vmatprep.subr.bf16.mxu0 %v3047_v53  ;;  %v3134_v53 = vld [vmem:[#allocation5 + $0x328] ss:$16 sps:$4 sm:$0xff]  }
  0xa4   :  { %1843 = vmatpush1.bf16.msra.mxu1 %v3048_v56  ;;  %v3137_v56 = vld [vmem:[#allocation5 + $0x740] ss:$16 sps:$4 sm:$0xff]  }
  0xa5   :  { %1761 = vmatpush1.bf16.msra.mxu0 %v3045_v55  ;;  %1844 = vmatprep.subr.bf16.mxu1 %v3056_v58  ;;  %v3142_v55 = vld [vmem:[#allocation5 + $0x34c] ss:$16 sps:$4 sm:$0xff]   ;;  %v3145_v58 = vld [vmem:[#allocation5 + $0x764] ss:$16 sps:$4 sm:$0xff]  }
  0xa6   :  { %1762 = vmatprep.subr.bf16.mxu0 %v3053_v57  ;;  %v3140_v57 = vld [vmem:[#allocation5 + $0x348] ss:$16 sps:$4 sm:$0xff]  }
  0xa8   :  { %1845 = vmatpush1.bf16.msra.mxu1 %v3054_v60  ;;  %v3143_v60 = vld [vmem:[#allocation5 + $0x760] ss:$16 sps:$4 sm:$0xff]  }
  0xa9   :  { %1763 = vmatpush1.bf16.msra.mxu0 %v3051_v59  ;;  %1846 = vmatprep.subr.bf16.mxu1 %v3062_v62  ;;  %v3148_v59 = vld [vmem:[#allocation5 + $0x36c] ss:$16 sps:$4 sm:$0xff]   ;;  %v3151_v62 = vld [vmem:[#allocation5 + $0x784] ss:$16 sps:$4 sm:$0xff]  }
  0xaa   :  { %1764 = vmatprep.subr.bf16.mxu0 %v3059_v61  ;;  %v3146_v61 = vld [vmem:[#allocation5 + $0x368] ss:$16 sps:$4 sm:$0xff]  }
  0xac   :  { %1847 = vmatpush1.bf16.msra.mxu1 %v3060_v0  ;;  %v3149_v0 = vld [vmem:[#allocation5 + $0x780] ss:$16 sps:$4 sm:$0xff]  }
  0xad   :  { %1765 = vmatpush1.bf16.msra.mxu0 %v3057_v63  ;;  %1848 = vmatprep.subr.bf16.mxu1 %v3068_v2  ;;  %v3154_v63 = vld [vmem:[#allocation5 + $0x38c] ss:$16 sps:$4 sm:$0xff]   ;;  %v3157_v2 = vld [vmem:[#allocation5 + $0x7a4] ss:$16 sps:$4 sm:$0xff]  }
  0xae   :  { %1766 = vmatprep.subr.bf16.mxu0 %v3065_v1  ;;  %v3152_v1 = vld [vmem:[#allocation5 + $0x388] ss:$16 sps:$4 sm:$0xff]  }
  0xb0   :  { %1849 = vmatpush1.bf16.msra.mxu1 %v3066_v4  ;;  %v3155_v4 = vld [vmem:[#allocation5 + $0x7a0] ss:$16 sps:$4 sm:$0xff]  }
  0xb1   :  { %1767 = vmatpush1.bf16.msra.mxu0 %v3063_v3  ;;  %1850 = vmatprep.subr.bf16.mxu1 %v3074_v8  ;;  %v3160_v3 = vld [vmem:[#allocation5 + $0x3ac] ss:$16 sps:$4 sm:$0xff]   ;;  %v3163_v8 = vld [vmem:[#allocation5 + $0x7c4] ss:$16 sps:$4 sm:$0xff]  }
  0xb2   :  { %1768 = vmatprep.subr.bf16.mxu0 %v3071_v5  ;;  %v3158_v5 = vld [vmem:[#allocation5 + $0x3a8] ss:$16 sps:$4 sm:$0xff]  }
  0xb4   :  { %1851 = vmatpush1.bf16.msra.mxu1 %v3072_v10  ;;  %v3161_v10 = vld [vmem:[#allocation5 + $0x7c0] ss:$16 sps:$4 sm:$0xff]  }
  0xb5   :  { %1769 = vmatpush1.bf16.msra.mxu0 %v3069_v9  ;;  %1861 = vmatprep.subr.bf16.mxu1 %v3082_v12  ;;  %v3166_v9 = vld [vmem:[#allocation5 + $0x3cc] ss:$16 sps:$4 sm:$0xff]   ;;  %v3169_v12 = vld [vmem:[#allocation5 + $0x7e4] ss:$16 sps:$4 sm:$0xff]  }
  0xb6   :  { %1779 = vmatprep.subr.bf16.mxu0 %v3079_v11  ;;  %v3164_v11 = vld [vmem:[#allocation5 + $0x3c8] ss:$16 sps:$4 sm:$0xff]  }
  0xb7   :  { %1853 = vmatmul.mubr.bf16.vlgmr.msra.gmra.mrb[4].mxu1 %v3526_v6  ;;  %v3100_v6 = vld [vmem:[#allocation5 + $0x26c] ss:$16 sps:$4 sm:$0xff]  }
  0xb8   :  { %1771 = vmatmul.mubr.bf16.vlgmr.msra.gmra.mrb[0].mxu0 %v3542_v13  ;;  %1862 = vmatpush1.bf16.msra.mxu1 %v3080_v15  ;;  %v3167_v15 = vld [vmem:[#allocation5 + $0x7e0] ss:$16 sps:$4 sm:$0xff]  }
  0xb9   :  { %1780 = vmatpush1.bf16.msra.mxu0 %v3077_v14  ;;  %1863 = vmatprep.subr.bf16.mxu1 %v3088_v17  ;;  %v3172_v14 = vld [vmem:[#allocation5 + $0x3ec] ss:$16 sps:$4 sm:$0xff]  }
  0xba   :  { %1781 = vmatprep.subr.bf16.mxu0 %v3085_v16  ;;  %1811 = vmatprep.mubr.bf16.mxu0 %v3548_v19  ;;  %v3170_v16 = vld [vmem:[#allocation5 + $0x3e8] ss:$16 sps:$4 sm:$0xff]   ;;  %v3177_v17 = vld [vmem:[#allocation5 + $0x40c] ss:$16 sps:$4 sm:$0xff]  }
  0xbb   :  { %1893 = vmatprep.mubr.bf16.mxu1 %v3522_v51  ;;  %v3109_v51 = vld [vmem:[#allocation5 + $0x6a4] ss:$16 sps:$4 sm:$0xff]  }
  0xbc   :  { %1864 = vmatpush1.bf16.msra.mxu1 %v3086_v21  ;;  %v3556_v21 = vcombine.low %v3544_v18, %v3544_v18  ;;  %v3274_v18 = vld [vmem:[#allocation7 + $0x10] ss:$8 sps:$4 sm:$0xff]  }
  0xbd   :  { %1782 = vmatpush1.bf16.msra.mxu0 %v3083_v20  ;;  %1865 = vmatprep.subr.bf16.mxu1 %v3094_v23  ;;  %v3175_v20 = vld [vmem:[#allocation5 + $0x408] ss:$16 sps:$4 sm:$0xff]  }
  0xbe   :  { %1783 = vmatprep.subr.bf16.mxu0 %v3091_v22  ;;  %v3180_v22 = vld [vmem:[#allocation5 + $0x42c] ss:$16 sps:$4 sm:$0xff]   ;;  %v3271_v23 = vld [vmem:[#allocation7] ss:$8 sps:$4 sm:$0xff]  }
  0xc0   :  { %1866 = vmatpush1.bf16.msra.mxu1 %v3092_v25  ;;  %v3178_v25 = vld [vmem:[#allocation5 + $0x428] ss:$16 sps:$4 sm:$0xff]  }
  0xc1   :  { %1784 = vmatpush1.bf16.msra.mxu0 %v3089_v24  ;;  %1867 = vmatprep.subr.bf16.mxu1 %v3100_v6  ;;  %v3273_v24 = vld [vmem:[#allocation7 + $0x4] ss:$8 sps:$4 sm:$0xff]  }
  0xc2   :  { %1785 = vmatprep.subr.bf16.mxu0 %v3097_v26  ;;  %v3276_v26 = vld [vmem:[#allocation7 + $0x14] ss:$8 sps:$4 sm:$0xff]  }
  0xc3   :  { %v3183_v6 = vld [vmem:[#allocation5 + $0x44c] ss:$16 sps:$4 sm:$0xff]  }
  0xc4   :  { %1868 = vmatpush1.bf16.msra.mxu1 %v3098_v28  ;;  %v3181_v28 = vld [vmem:[#allocation5 + $0x448] ss:$16 sps:$4 sm:$0xff]  }
  0xc5   :  { %1786 = vmatpush1.bf16.msra.mxu0 %v3095_v27  ;;  %1869 = vmatprep.subr.bf16.mxu1 %v3106_v30  ;;  %v3279_v27 = vld [vmem:[#allocation7 + $0x24] ss:$8 sps:$4 sm:$0xff]   ;;  %v3282_v30 = vld [vmem:[#allocation7 + $0x34] ss:$8 sps:$4 sm:$0xff]  }
  0xc6   :  { %1787 = vmatprep.subr.bf16.mxu0 %v3103_v29  ;;  %v3186_v29 = vld [vmem:[#allocation5 + $0x46c] ss:$16 sps:$4 sm:$0xff]  }
  0xc8   :  { %1870 = vmatpush1.bf16.msra.mxu1 %v3104_v32  ;;  %v3280_v32 = vld [vmem:[#allocation7 + $0x30] ss:$8 sps:$4 sm:$0xff]  }
  0xc9   :  { %1788 = vmatpush1.bf16.msra.mxu0 %v3101_v31  ;;  %1871 = vmatprep.subr.bf16.mxu1 %v3112_v33  ;;  %v3184_v31 = vld [vmem:[#allocation5 + $0x468] ss:$16 sps:$4 sm:$0xff]  }
  0xca   :  { %1789 = vmatprep.subr.bf16.mxu0 %v3109_v51  ;;  %v3285_v51 = vld [vmem:[#allocation7 + $0x44] ss:$8 sps:$4 sm:$0xff]   ;;  %v3187_v33 = vld [vmem:[#allocation5 + $0x488] ss:$16 sps:$4 sm:$0xff]  }
  0xcc   :  { %1872 = vmatpush1.bf16.msra.mxu1 %v3110_v36  ;;  %v3283_v36 = vld [vmem:[#allocation7 + $0x40] ss:$8 sps:$4 sm:$0xff]  }
  0xcd   :  { %1790 = vmatpush1.bf16.msra.mxu0 %v3107_v35  ;;  %1873 = vmatprep.subr.bf16.mxu1 %v3118_v38  ;;  %v3192_v35 = vld [vmem:[#allocation5 + $0x4ac] ss:$16 sps:$4 sm:$0xff]   ;;  %v3190_v38 = vld [vmem:[#allocation5 + $0x4a8] ss:$16 sps:$4 sm:$0xff]  }
  0xce   :  { %1791 = vmatprep.subr.bf16.mxu0 %v3115_v37  ;;  %v3288_v37 = vld [vmem:[#allocation7 + $0x54] ss:$8 sps:$4 sm:$0xff]  }
  0xd0   :  { %1874 = vmatpush1.bf16.msra.mxu1 %v3116_v40  ;;  %v3286_v40 = vld [vmem:[#allocation7 + $0x50] ss:$8 sps:$4 sm:$0xff]  }
  0xd1   :  { %1792 = vmatpush1.bf16.msra.mxu0 %v3113_v39  ;;  %1875 = vmatprep.subr.bf16.mxu1 %v3124_v42  ;;  %v3195_v39 = vld [vmem:[#allocation5 + $0x4cc] ss:$16 sps:$4 sm:$0xff]   ;;  %v3193_v42 = vld [vmem:[#allocation5 + $0x4c8] ss:$16 sps:$4 sm:$0xff]  }
  0xd2   :  { %1793 = vmatprep.subr.bf16.mxu0 %v3121_v41  ;;  %v3291_v41 = vld [vmem:[#allocation7 + $0x64] ss:$8 sps:$4 sm:$0xff]  }
  0xd4   :  { %1876 = vmatpush1.bf16.msra.mxu1 %v3122_v44  ;;  %v3289_v44 = vld [vmem:[#allocation7 + $0x60] ss:$8 sps:$4 sm:$0xff]  }
  0xd5   :  { %1794 = vmatpush1.bf16.msra.mxu0 %v3119_v43  ;;  %1877 = vmatprep.subr.bf16.mxu1 %v3130_v46  ;;  %v3198_v43 = vld [vmem:[#allocation5 + $0x4ec] ss:$16 sps:$4 sm:$0xff]   ;;  %v3196_v46 = vld [vmem:[#allocation5 + $0x4e8] ss:$16 sps:$4 sm:$0xff]  }
  0xd6   :  { %1795 = vmatprep.subr.bf16.mxu0 %v3127_v45  ;;  %v3294_v45 = vld [vmem:[#allocation7 + $0x74] ss:$8 sps:$4 sm:$0xff]  }
  0xd8   :  { %1878 = vmatpush1.bf16.msra.mxu1 %v3128_v48  ;;  %v3292_v48 = vld [vmem:[#allocation7 + $0x70] ss:$8 sps:$4 sm:$0xff]  }
  0xd9   :  { %1796 = vmatpush1.bf16.msra.mxu0 %v3125_v47  ;;  %1879 = vmatprep.subr.bf16.mxu1 %v3136_v50  ;;  %v3201_v47 = vld [vmem:[#allocation5 + $0x50c] ss:$16 sps:$4 sm:$0xff]   ;;  %v3199_v50 = vld [vmem:[#allocation5 + $0x508] ss:$16 sps:$4 sm:$0xff]  }
  0xda   :  { %1797 = vmatprep.subr.bf16.mxu0 %v3133_v49  ;;  %v3297_v49 = vld [vmem:[#allocation7 + $0x84] ss:$8 sps:$4 sm:$0xff]  }
  0xdc   :  { %1880 = vmatpush1.bf16.msra.mxu1 %v3134_v53  ;;  %v3295_v53 = vld [vmem:[#allocation7 + $0x80] ss:$8 sps:$4 sm:$0xff]  }
  0xdd   :  { %1798 = vmatpush1.bf16.msra.mxu0 %v3131_v52  ;;  %1881 = vmatprep.subr.bf16.mxu1 %v3142_v55  ;;  %v3204_v52 = vld [vmem:[#allocation5 + $0x52c] ss:$16 sps:$4 sm:$0xff]   ;;  %v3202_v55 = vld [vmem:[#allocation5 + $0x528] ss:$16 sps:$4 sm:$0xff]  }
  0xde   :  { %1799 = vmatprep.subr.bf16.mxu0 %v3139_v54  ;;  %v3300_v54 = vld [vmem:[#allocation7 + $0x94] ss:$8 sps:$4 sm:$0xff]  }
  0xe0   :  { %1882 = vmatpush1.bf16.msra.mxu1 %v3140_v57  ;;  %v3298_v57 = vld [vmem:[#allocation7 + $0x90] ss:$8 sps:$4 sm:$0xff]  }
  0xe1   :  { %1800 = vmatpush1.bf16.msra.mxu0 %v3137_v56  ;;  %1883 = vmatprep.subr.bf16.mxu1 %v3148_v59  ;;  %v3207_v56 = vld [vmem:[#allocation5 + $0x54c] ss:$16 sps:$4 sm:$0xff]   ;;  %v3205_v59 = vld [vmem:[#allocation5 + $0x548] ss:$16 sps:$4 sm:$0xff]  }
  0xe2   :  { %1801 = vmatprep.subr.bf16.mxu0 %v3145_v58  ;;  %v3303_v58 = vld [vmem:[#allocation7 + $0xa4] ss:$8 sps:$4 sm:$0xff]  }
  0xe4   :  { %1884 = vmatpush1.bf16.msra.mxu1 %v3146_v61  ;;  %v3301_v61 = vld [vmem:[#allocation7 + $0xa0] ss:$8 sps:$4 sm:$0xff]  }
  0xe5   :  { %1802 = vmatpush1.bf16.msra.mxu0 %v3143_v60  ;;  %1885 = vmatprep.subr.bf16.mxu1 %v3154_v63  ;;  %v3210_v60 = vld [vmem:[#allocation5 + $0x56c] ss:$16 sps:$4 sm:$0xff]   ;;  %v3208_v63 = vld [vmem:[#allocation5 + $0x568] ss:$16 sps:$4 sm:$0xff]  }
  0xe6   :  { %1803 = vmatprep.subr.bf16.mxu0 %v3151_v62  ;;  %v3306_v62 = vld [vmem:[#allocation7 + $0xb4] ss:$8 sps:$4 sm:$0xff]  }
  0xe8   :  { %1886 = vmatpush1.bf16.msra.mxu1 %v3152_v1  ;;  %v3304_v1 = vld [vmem:[#allocation7 + $0xb0] ss:$8 sps:$4 sm:$0xff]  }
  0xe9   :  { %1804 = vmatpush1.bf16.msra.mxu0 %v3149_v0  ;;  %1887 = vmatprep.subr.bf16.mxu1 %v3160_v3  ;;  %v3213_v0 = vld [vmem:[#allocation5 + $0x58c] ss:$16 sps:$4 sm:$0xff]   ;;  %v3211_v3 = vld [vmem:[#allocation5 + $0x588] ss:$16 sps:$4 sm:$0xff]  }
  0xea   :  { %1805 = vmatprep.subr.bf16.mxu0 %v3157_v2  ;;  %v3309_v2 = vld [vmem:[#allocation7 + $0xc4] ss:$8 sps:$4 sm:$0xff]  }
  0xec   :  { %1888 = vmatpush1.bf16.msra.mxu1 %v3158_v5  ;;  %v3307_v5 = vld [vmem:[#allocation7 + $0xc0] ss:$8 sps:$4 sm:$0xff]  }
  0xed   :  { %1806 = vmatpush1.bf16.msra.mxu0 %v3155_v4  ;;  %1889 = vmatprep.subr.bf16.mxu1 %v3166_v9  ;;  %v3216_v4 = vld [vmem:[#allocation5 + $0x5ac] ss:$16 sps:$4 sm:$0xff]   ;;  %v3214_v9 = vld [vmem:[#allocation5 + $0x5a8] ss:$16 sps:$4 sm:$0xff]  }
  0xee   :  { %1807 = vmatprep.subr.bf16.mxu0 %v3163_v8  ;;  %v3312_v8 = vld [vmem:[#allocation7 + $0xd4] ss:$8 sps:$4 sm:$0xff]  }
  0xf0   :  { %1890 = vmatpush1.bf16.msra.mxu1 %v3164_v11  ;;  %v3310_v11 = vld [vmem:[#allocation7 + $0xd0] ss:$8 sps:$4 sm:$0xff]  }
  0xf1   :  { %1808 = vmatpush1.bf16.msra.mxu0 %v3161_v10  ;;  %1891 = vmatprep.subr.bf16.mxu1 %v3172_v14  ;;  %v3219_v10 = vld [vmem:[#allocation5 + $0x5cc] ss:$16 sps:$4 sm:$0xff]  }
  0xf2   :  { %1809 = vmatprep.subr.bf16.mxu0 %v3169_v12  ;;  %v3217_v12 = vld [vmem:[#allocation5 + $0x5c8] ss:$16 sps:$4 sm:$0xff]   ;;  %v3222_v14 = vld [vmem:[#allocation5 + $0x5ec] ss:$16 sps:$4 sm:$0xff]  }
  0xf4   :  { %1892 = vmatpush1.bf16.msra.mxu1 %v3170_v16  ;;  %v3225_v16 = vld [vmem:[#allocation5 + $0x60c] ss:$16 sps:$4 sm:$0xff]  }
  0xf5   :  { %1810 = vmatpush1.bf16.msra.mxu0 %v3167_v15  ;;  %1902 = vmatprep.subr.bf16.mxu1 %v3177_v17  ;;  %v3220_v15 = vld [vmem:[#allocation5 + $0x5e8] ss:$16 sps:$4 sm:$0xff]  }
  0xf6   :  { %2396 = vmatprep.subr.bf16.mxu0 %v3273_v24  ;;  %v3223_v17 = vld [vmem:[#allocation5 + $0x608] ss:$16 sps:$4 sm:$0xff]  }
  0xf7   :  { %1894 = vmatmul.mubr.bf16.vlgmr.msra.gmra.mrb[4].mxu1 %v3528_v7  ;;  %v3277_v7 = vld [vmem:[#allocation7 + $0x20] ss:$8 sps:$4 sm:$0xff]  }
  0xf8   :  { %1812 = vmatmul.mubr.bf16.vlgmr.msra.gmra.mrb[0].mxu0 %v3556_v21  ;;  %1903 = vmatpush1.bf16.msra.mxu1 %v3175_v20  ;;  %v3228_v20 = vld [vmem:[#allocation5 + $0x62c] ss:$16 sps:$4 sm:$0xff]   ;;  %v3229_v24 = vld [vmem:[#allocation5 + $0x648] ss:$16 sps:$4 sm:$0xff]  }
  0xf9   :  { %1934 = vmatprep.mubr.bf16.mxu1 %v3537_v34  ;;  %1904 = vmatprep.subr.bf16.mxu1 %v3180_v22  ;;  %v3189_v34 = vld [vmem:[#allocation5 + $0x48c] ss:$16 sps:$4 sm:$0xff]   ;;  %v3226_v22 = vld [vmem:[#allocation5 + $0x628] ss:$16 sps:$4 sm:$0xff]  }
  0xfa   :  { %2397 = vmatpush1.bf16.msra.mxu0 %v3271_v23  ;;  %v3231_v23 = vld [vmem:[#allocation5 + $0x64c] ss:$16 sps:$4 sm:$0xff]  }
  0xfb   :  { %2398 = vmatprep.subr.bf16.mxu0 %v3276_v26  ;;  %v3232_v26 = vld [vmem:[#allocation5 + $0x668] ss:$16 sps:$4 sm:$0xff]  }
  0xfc   :  { %1905 = vmatpush1.bf16.msra.mxu1 %v3178_v25  ;;  %v3234_v25 = vld [vmem:[#allocation5 + $0x66c] ss:$16 sps:$4 sm:$0xff]  }
  0xfd   :  { %1906 = vmatprep.subr.bf16.mxu1 %v3183_v6  ;;  %v3237_v6 = vld [vmem:[#allocation5 + $0x68c] ss:$16 sps:$4 sm:$0xff]  }
  0xfe   :  { %2399 = vmatpush1.bf16.msra.mxu0 %v3274_v18  ;;  %v3235_v18 = vld [vmem:[#allocation5 + $0x688] ss:$16 sps:$4 sm:$0xff]  }
  0xff   :  { %2400 = vmatprep.subr.bf16.mxu0 %v3279_v27  ;;  %v3240_v27 = vld [vmem:[#allocation5 + $0x6ac] ss:$16 sps:$4 sm:$0xff]  }
 0x100   :  { %1907 = vmatpush1.bf16.msra.mxu1 %v3181_v28  ;;  %v3243_v28 = vld [vmem:[#allocation5 + $0x6cc] ss:$16 sps:$4 sm:$0xff]  }
 0x101   :  { %1908 = vmatprep.subr.bf16.mxu1 %v3186_v29 }
 0x102   :  { %2401 = vmatpush1.bf16.msra.mxu0 %v3277_v7 }
 0x103   :  { %2402 = vmatprep.subr.bf16.mxu0 %v3282_v30  ;;  %v3313_v30 = vld [vmem:[#allocation7 + $0xe0] ss:$8 sps:$4 sm:$0xff]  }
 0x104   :  { %1909 = vmatpush1.bf16.msra.mxu1 %v3184_v31 }
 0x105   :  { %1910 = vmatprep.subr.bf16.mxu1 %v3189_v34  ;;  %v3241_v34 = vld [vmem:[#allocation5 + $0x6c8] ss:$16 sps:$4 sm:$0xff]  }
 0x106   :  { %2403 = vmatpush1.bf16.msra.mxu0 %v3280_v32 }
 0x107   :  { %2404 = vmatprep.subr.bf16.mxu0 %v3285_v51  ;;  %v3246_v51 = vld [vmem:[#allocation5 + $0x6ec] ss:$16 sps:$4 sm:$0xff]  }
 0x108   :  { %1911 = vmatpush1.bf16.msra.mxu1 %v3187_v33  ;;  %v3318_v33 = vld [vmem:[#allocation7 + $0xf4] ss:$8 sps:$4 sm:$0xff]  }
 0x109   :  { %1912 = vmatprep.subr.bf16.mxu1 %v3192_v35  ;;  %v3316_v35 = vld [vmem:[#allocation7 + $0xf0] ss:$8 sps:$4 sm:$0xff]  }
 0x10a   :  { %2405 = vmatpush1.bf16.msra.mxu0 %v3283_v36  ;;  %v3244_v36 = vld [vmem:[#allocation5 + $0x6e8] ss:$16 sps:$4 sm:$0xff]  }
 0x10b   :  { %2406 = vmatprep.subr.bf16.mxu0 %v3288_v37  ;;  %v3249_v37 = vld [vmem:[#allocation5 + $0x70c] ss:$16 sps:$4 sm:$0xff]  }
 0x10c   :  { %1913 = vmatpush1.bf16.msra.mxu1 %v3190_v38  ;;  %v3247_v38 = vld [vmem:[#allocation5 + $0x708] ss:$16 sps:$4 sm:$0xff]  }
 0x10d   :  { %1914 = vmatprep.subr.bf16.mxu1 %v3195_v39  ;;  %v3321_v39 = vld [vmem:[#allocation7 + $0x104] ss:$8 sps:$4 sm:$0xff]  }
 0x10e   :  { %2407 = vmatpush1.bf16.msra.mxu0 %v3286_v40  ;;  %v3252_v40 = vld [vmem:[#allocation5 + $0x72c] ss:$16 sps:$4 sm:$0xff]  }
 0x10f   :  { %2408 = vmatprep.subr.bf16.mxu0 %v3291_v41  ;;  %v3250_v41 = vld [vmem:[#allocation5 + $0x728] ss:$16 sps:$4 sm:$0xff]  }
 0x110   :  { %1915 = vmatpush1.bf16.msra.mxu1 %v3193_v42  ;;  %v3255_v42 = vld [vmem:[#allocation5 + $0x74c] ss:$16 sps:$4 sm:$0xff]  }
 0x111   :  { %1916 = vmatprep.subr.bf16.mxu1 %v3198_v43  ;;  %v3253_v43 = vld [vmem:[#allocation5 + $0x748] ss:$16 sps:$4 sm:$0xff]  }
 0x112   :  { %2409 = vmatpush1.bf16.msra.mxu0 %v3289_v44  ;;  %v3258_v44 = vld [vmem:[#allocation5 + $0x76c] ss:$16 sps:$4 sm:$0xff]  }
 0x113   :  { %2410 = vmatprep.subr.bf16.mxu0 %v3294_v45  ;;  %v3256_v45 = vld [vmem:[#allocation5 + $0x768] ss:$16 sps:$4 sm:$0xff]  }
 0x114   :  { %1917 = vmatpush1.bf16.msra.mxu1 %v3196_v46  ;;  %v3261_v46 = vld [vmem:[#allocation5 + $0x78c] ss:$16 sps:$4 sm:$0xff]  }
 0x115   :  { %1918 = vmatprep.subr.bf16.mxu1 %v3201_v47  ;;  %v3259_v47 = vld [vmem:[#allocation5 + $0x788] ss:$16 sps:$4 sm:$0xff]  }
 0x116   :  { %2411 = vmatpush1.bf16.msra.mxu0 %v3292_v48  ;;  %v3264_v48 = vld [vmem:[#allocation5 + $0x7ac] ss:$16 sps:$4 sm:$0xff]  }
 0x117   :  { %2412 = vmatprep.subr.bf16.mxu0 %v3297_v49  ;;  %v3262_v49 = vld [vmem:[#allocation5 + $0x7a8] ss:$16 sps:$4 sm:$0xff]  }
 0x118   :  { %1919 = vmatpush1.bf16.msra.mxu1 %v3199_v50  ;;  %v3267_v50 = vld [vmem:[#allocation5 + $0x7cc] ss:$16 sps:$4 sm:$0xff]  }
 0x119   :  { %1920 = vmatprep.subr.bf16.mxu1 %v3204_v52  ;;  %v3265_v52 = vld [vmem:[#allocation5 + $0x7c8] ss:$16 sps:$4 sm:$0xff]  }
 0x11a   :  { %2413 = vmatpush1.bf16.msra.mxu0 %v3295_v53  ;;  %v3270_v53 = vld [vmem:[#allocation5 + $0x7ec] ss:$16 sps:$4 sm:$0xff]  }
 0x11b   :  { %2414 = vmatprep.subr.bf16.mxu0 %v3300_v54  ;;  %v3268_v54 = vld [vmem:[#allocation5 + $0x7e8] ss:$16 sps:$4 sm:$0xff]  }
 0x11c   :  { %1921 = vmatpush1.bf16.msra.mxu1 %v3202_v55  ;;  %v328_v55 = vlaneseq }
 0x11d   :  { %1922 = vmatprep.subr.bf16.mxu1 %v3207_v56 }
 0x11e   :  { %2415 = vmatpush1.bf16.msra.mxu0 %v3298_v57  ;;  %v3564_v56 = vshrl.u32 %v328_v55, 7 }
 0x11f   :  { %2416 = vmatprep.subr.bf16.mxu0 %v3303_v58  ;;  %v3572_v58 = vld [vmem:[%s3603_s2] sm:$0xf] }
 0x120   :  { %1923 = vmatpush1.bf16.msra.mxu1 %v3205_v59  ;;  %v3567_v57 = vsub.s32 0, %v3564_v56  ;;  %v3575_v59 = vsub.s32 1, %v3564_v56 }
 0x121   :  { %1924 = vmatprep.subr.bf16.mxu1 %v3210_v60 }
 0x122   :  { %2417 = vmatpush1.bf16.msra.mxu0 %v3301_v61  ;;  %v331_v60 = vrot.slane %v3572_v58, %v3567_v57 }
 0x123   :  { %2418 = vmatprep.subr.bf16.mxu0 %v3306_v62 }
 0x124   :  { %1925 = vmatpush1.bf16.msra.mxu1 %v3208_v63 }
 0x125   :  { %1926 = vmatprep.subr.bf16.mxu1 %v3213_v0 }
 0x126   :  { %2419 = vmatpush1.bf16.msra.mxu0 %v3304_v1 }
 0x127   :  { %2420 = vmatprep.subr.bf16.mxu0 %v3309_v2 }
 0x128   :  { %1927 = vmatpush1.bf16.msra.mxu1 %v3211_v3 }
 0x129   :  { %1928 = vmatprep.subr.bf16.mxu1 %v3216_v4 }
 0x12a   :  { %2421 = vmatpush1.bf16.msra.mxu0 %v3307_v5 }
 0x12b   :  { %2422 = vmatprep.subr.bf16.mxu0 %v3312_v8 }
 0x12c   :  { %1929 = vmatpush1.bf16.msra.mxu1 %v3214_v9 }
 0x12d   :  { %1930 = vmatprep.subr.bf16.mxu1 %v3219_v10 }
 0x12e   :  { %2423 = vmatpush1.bf16.msra.mxu0 %v3310_v11 }
 0x130   :  { %1931 = vmatpush1.bf16.msra.mxu1 %v3217_v12  ;;  %v3319_v12 = vld [vmem:[#allocation7 + $0x100] ss:$8 sps:$4 sm:$0xff]  }
 0x131   :  { %1932 = vmatprep.subr.bf16.mxu1 %v3222_v14 }
 0x134   :  { %1933 = vmatpush1.bf16.msra.mxu1 %v3220_v15  ;;  %v3324_v15 = vld [vmem:[#allocation7 + $0x114] ss:$8 sps:$4 sm:$0xff]  }
 0x135   :  { %1943 = vmatprep.subr.bf16.mxu1 %v3225_v16  ;;  %v3322_v16 = vld [vmem:[#allocation7 + $0x110] ss:$8 sps:$4 sm:$0xff]  }
 0x137   :  { %1935 = vmatmul.mubr.bf16.vlgmr.msra.gmra.mrb[4].mxu1 %v3542_v13  ;;  %v3238_v13 = vld [vmem:[#allocation5 + $0x6a8] ss:$16 sps:$4 sm:$0xff]  }
 0x138   :  { %1944 = vmatpush1.bf16.msra.mxu1 %v3223_v17  ;;  %1975 = vmatprep.mubr.bf16.mxu1 %v3548_v19  ;;  %v3315_v19 = vld [vmem:[#allocation7 + $0xe4] ss:$8 sps:$4 sm:$0xff]  }
 0x139   :  { %1945 = vmatprep.subr.bf16.mxu1 %v3228_v20  ;;  %2424 = vmatprep.subr.bf16.mxu0 %v3315_v19  ;;  %v3327_v17 = vld [vmem:[#allocation7 + $0x124] ss:$8 sps:$4 sm:$0xff]   ;;  %v3325_v20 = vld [vmem:[#allocation7 + $0x120] ss:$8 sps:$4 sm:$0xff]  }
 0x13a   :  { %2425 = vmatpush1.bf16.msra.mxu0 %v3313_v30  ;;  %v3343_v19 = vld [vmem:[#allocation7 + $0x180] ss:$8 sps:$4 sm:$0xff]   ;;  %v3346_v30 = vld [vmem:[#allocation7 + $0x190] ss:$8 sps:$4 sm:$0xff]  }
 0x13b   :  { %2426 = vmatprep.subr.bf16.mxu0 %v3318_v33  ;;  %v3357_v33 = vld [vmem:[#allocation7 + $0x1c4] ss:$8 sps:$4 sm:$0xff]  }
 0x13c   :  { %1946 = vmatpush1.bf16.msra.mxu1 %v3226_v22  ;;  %v3330_v22 = vld [vmem:[#allocation7 + $0x134] ss:$8 sps:$4 sm:$0xff]  }
 0x13d   :  { %1947 = vmatprep.subr.bf16.mxu1 %v3231_v23  ;;  %v3328_v23 = vld [vmem:[#allocation7 + $0x130] ss:$8 sps:$4 sm:$0xff]  }
 0x13e   :  { %2427 = vmatpush1.bf16.msra.mxu0 %v3316_v35  ;;  %v3355_v35 = vld [vmem:[#allocation7 + $0x1c0] ss:$8 sps:$4 sm:$0xff]  }
 0x13f   :  { %2437 = vmatprep.subr.bf16.mxu0 %v3321_v39  ;;  %v3361_v39 = vld [vmem:[#allocation7 + $0x1e0] ss:$8 sps:$4 sm:$0xff]  }
 0x140   :  { %1948 = vmatpush1.bf16.msra.mxu1 %v3229_v24  ;;  %v3333_v24 = vld [vmem:[#allocation7 + $0x144] ss:$8 sps:$4 sm:$0xff]  }
 0x141   :  { %1949 = vmatprep.subr.bf16.mxu1 %v3234_v25  ;;  %v3331_v25 = vld [vmem:[#allocation7 + $0x140] ss:$8 sps:$4 sm:$0xff]  }
 0x144   :  { %1950 = vmatpush1.bf16.msra.mxu1 %v3232_v26  ;;  %v3336_v26 = vld [vmem:[#allocation7 + $0x154] ss:$8 sps:$4 sm:$0xff]  }
 0x145   :  { %1951 = vmatprep.subr.bf16.mxu1 %v3237_v6  ;;  %v3334_v6 = vld [vmem:[#allocation7 + $0x150] ss:$8 sps:$4 sm:$0xff]  }
 0x148   :  { %1952 = vmatpush1.bf16.msra.mxu1 %v3235_v18  ;;  %v3339_v18 = vld [vmem:[#allocation7 + $0x164] ss:$8 sps:$4 sm:$0xff]  }
 0x149   :  { %1953 = vmatprep.subr.bf16.mxu1 %v3240_v27  ;;  %v3337_v27 = vld [vmem:[#allocation7 + $0x160] ss:$8 sps:$4 sm:$0xff]  }
 0x14a   :  { %v1690_v29 = vpop.f32.mrb[0].mxu1 }
 0x14b   :  { %v1692_v7 = vpop.f32.mrb[1].mxu1  ;;  %v1691_v61 = vadd.f32 %v1690_v29, %v331_v60  ;;  %v3345_v29 = vld [vmem:[#allocation7 + $0x184] ss:$8 sps:$4 sm:$0xff]  }
 0x14c   :  { %v1694_v31 = vpop.f32.mrb[2].mxu1  ;;  %1954 = vmatpush1.bf16.msra.mxu1 %v3238_v13  ;;  %v3342_v13 = vld [vmem:[#allocation7 + $0x174] ss:$8 sps:$4 sm:$0xff]  }
 0x14d   :  { %v1695_v32 = vpop.f32.mrb[3].mxu1  ;;  %1955 = vmatprep.subr.bf16.mxu1 %v3243_v28  ;;  %v3340_v28 = vld [vmem:[#allocation7 + $0x170] ss:$8 sps:$4 sm:$0xff]   ;;  %v3351_v31 = vld [vmem:[#allocation7 + $0x1a4] ss:$8 sps:$4 sm:$0xff]  }
 0x14e   :  { %v3354_v32 = vld [vmem:[#allocation7 + $0x1b4] ss:$8 sps:$4 sm:$0xff]  }
 0x150   :  { %1956 = vmatpush1.bf16.msra.mxu1 %v3241_v34  ;;  %v3349_v34 = vld [vmem:[#allocation7 + $0x1a0] ss:$8 sps:$4 sm:$0xff]  }
 0x151   :  { %1957 = vmatprep.subr.bf16.mxu1 %v3246_v51  ;;  %v3352_v51 = vld [vmem:[#allocation7 + $0x1b0] ss:$8 sps:$4 sm:$0xff]  }
 0x154   :  { %1958 = vmatpush1.bf16.msra.mxu1 %v3244_v36  ;;  %v3360_v36 = vld [vmem:[#allocation7 + $0x1d4] ss:$8 sps:$4 sm:$0xff]  }
 0x155   :  { %1959 = vmatprep.subr.bf16.mxu1 %v3249_v37  ;;  %v3358_v37 = vld [vmem:[#allocation7 + $0x1d0] ss:$8 sps:$4 sm:$0xff]  }
 0x158   :  { %1960 = vmatpush1.bf16.msra.mxu1 %v3247_v38  ;;  %v3363_v38 = vld [vmem:[#allocation7 + $0x1e4] ss:$8 sps:$4 sm:$0xff]  }
 0x159   :  { %1961 = vmatprep.subr.bf16.mxu1 %v3252_v40  ;;  %v3366_v40 = vld [vmem:[#allocation7 + $0x1f4] ss:$8 sps:$4 sm:$0xff]  }
 0x15c   :  { %1962 = vmatpush1.bf16.msra.mxu1 %v3250_v41  ;;  %v3364_v41 = vld [vmem:[#allocation7 + $0x1f0] ss:$8 sps:$4 sm:$0xff]  }
 0x15d   :  { %1963 = vmatprep.subr.bf16.mxu1 %v3255_v42  ;;  %v338_v42 = vsub.s32 2, %v3564_v56 }
 0x160   :  { %1964 = vmatpush1.bf16.msra.mxu1 %v3253_v43  ;;  %v342_v43 = vsub.s32 3, %v3564_v56  ;;  %v2064_v56 = vld [vmem:[%s3605_s4] sm:$0x3] }
 0x161   :  { %1965 = vmatprep.subr.bf16.mxu1 %v3258_v44  ;;  %v339_v44 = vrot.slane %v3572_v58, %v338_v42 }
 0x164   :  { %1966 = vmatpush1.bf16.msra.mxu1 %v3256_v45  ;;  %v343_v45 = vrot.slane %v3572_v58, %v342_v43 }
 0x165   :  { %1967 = vmatprep.subr.bf16.mxu1 %v3261_v46 }
 0x168   :  { %1968 = vmatpush1.bf16.msra.mxu1 %v3259_v47 }
 0x169   :  { %1969 = vmatprep.subr.bf16.mxu1 %v3264_v48 }
 0x16c   :  { %1970 = vmatpush1.bf16.msra.mxu1 %v3262_v49 }
 0x16d   :  { %1971 = vmatprep.subr.bf16.mxu1 %v3267_v50 }
 0x170   :  { %1972 = vmatpush1.bf16.msra.mxu1 %v3265_v52 }
 0x171   :  { %1973 = vmatprep.subr.bf16.mxu1 %v3270_v53 }
 0x174   :  { %1974 = vmatpush1.bf16.msra.mxu1 %v3268_v54 }
 0x177   :  { %1976 = vmatmul.mubr.bf16.vlgmr.msra.gmra.mrb[4].mxu1 %v3556_v21  ;;  %v335_v21 = vrot.slane %v3572_v58, %v3575_v59  ;;  %v2069_v58 = vrot.slane %v2064_v56, %v3567_v57 }
 0x179   :  { %v1693_v62 = vadd.f32 %v1692_v7, %v335_v21  ;;  %v3348_v7 = vld [vmem:[#allocation7 + $0x194] ss:$8 sps:$4 sm:$0xff]  }
 0x1cb   :  { %v1813_v63 = vpop.f32.mrb[0].mxu0 }
 0x1cc   :  { %v2841_v0 = vadd.f32 %v1813_v63, %v1691_v61  ;;  %v1815_v1 = vpop.f32.mrb[1].mxu0  ;;  %v2484_v63 = vld [vmem:[%s3606_s5] sm:$0x3] }
 0x1cd   :  { %v2843_v2 = vadd.f32 %v1815_v1, %v1693_v62  ;;  %v1817_v3 = vpop.f32.mrb[2].mxu0  ;;  %v2073_v62 = vrot.slane %v2064_v56, %v3575_v59 }
 0x1ce   :  { %vm1984_vm0 = vcmp.gt.f32.partialorder %v2841_v0, 0.0  ;;  %v1988_v4 = vmul.f32 0.2, %v2841_v0  ;;  %v1818_v5 = vpop.f32.mrb[3].mxu0 }
 0x1cf   :  { %vm1985_vm1 = vcmp.gt.f32.partialorder %v2843_v2, 0.0  ;;  %v1989_v8 = vmul.f32 0.2, %v2843_v2  ;;  %v2489_v5 = vrot.slane %v2484_v63, %v3567_v57 }
 0x1d0   :  { %v1992_v9 = vsel %vm1984_vm0, %v2841_v0, %v1988_v4 }
 0x1d1   :  { %v1993_v10 = vsel %vm1985_vm1, %v2843_v2, %v1989_v8  ;;  %v1996_v14 = vpack.c.bf16 %v1992_v9, %v1992_v9 }
 0x1d2   :  { %v1997_v11 = vpack.c.bf16 %v1993_v10, %v1993_v10  ;;  %v2493_v10 = vrot.slane %v2484_v63, %v3575_v59 }
 0x1d4   :  { %2428 = vmatprep.mubr.bf16.mxu0 %v1997_v11 }
 0x1d5   :  { %2429 = vmatmul.mubr.bf16.vlgmr.msra.gmra.mrb[4].mxu0 %v1996_v14 }
 0x1d6   :  { %2438 = vmatpush1.bf16.msra.mxu0 %v3319_v12 }
 0x1d7   :  { %2439 = vmatprep.subr.bf16.mxu0 %v3324_v15 }
 0x1da   :  { %2440 = vmatpush1.bf16.msra.mxu0 %v3322_v16 }
 0x1db   :  { %2441 = vmatprep.subr.bf16.mxu0 %v3327_v17 }
 0x1de   :  { %2442 = vmatpush1.bf16.msra.mxu0 %v3325_v20  ;;  %v2502_v20 = vstv %s3607_s6 }
 0x1df   :  { %2443 = vmatprep.subr.bf16.mxu0 %v3330_v22 }
 0x1e2   :  { %2444 = vmatpush1.bf16.msra.mxu0 %v3328_v23 }
 0x1e3   :  { %2445 = vmatprep.subr.bf16.mxu0 %v3333_v24 }
 0x1e6   :  { %2446 = vmatpush1.bf16.msra.mxu0 %v3331_v25 }
 0x1e7   :  { %2447 = vmatprep.subr.bf16.mxu0 %v3336_v26 }
 0x1ea   :  { %2448 = vmatpush1.bf16.msra.mxu0 %v3334_v6 }
 0x1eb   :  { %2449 = vmatprep.subr.bf16.mxu0 %v3339_v18 }
 0x1ee   :  { %2450 = vmatpush1.bf16.msra.mxu0 %v3337_v27 }
 0x1ef   :  { %2451 = vmatprep.subr.bf16.mxu0 %v3342_v13 }
 0x1f2   :  { %2452 = vmatpush1.bf16.msra.mxu0 %v3340_v28 }
 0x1f3   :  { %2453 = vmatprep.subr.bf16.mxu0 %v3345_v29 }
 0x1f6   :  { %2454 = vmatpush1.bf16.msra.mxu0 %v3343_v19 }
 0x1f7   :  { %2455 = vmatprep.subr.bf16.mxu0 %v3348_v7 }
 0x1fa   :  { %2456 = vmatpush1.bf16.msra.mxu0 %v3346_v30 }
 0x1fb   :  { %2457 = vmatprep.subr.bf16.mxu0 %v3351_v31 }
 0x1fe   :  { %2458 = vmatpush1.bf16.msra.mxu0 %v3349_v34 }
 0x1ff   :  { %2459 = vmatprep.subr.bf16.mxu0 %v3354_v32 }
 0x202   :  { %2460 = vmatpush1.bf16.msra.mxu0 %v3352_v51 }
 0x203   :  { %2461 = vmatprep.subr.bf16.mxu0 %v3357_v33 }
 0x206   :  { %2462 = vmatpush1.bf16.msra.mxu0 %v3355_v35 }
 0x207   :  { %2463 = vmatprep.subr.bf16.mxu0 %v3360_v36 }
 0x20a   :  { %2464 = vmatpush1.bf16.msra.mxu0 %v3358_v37 }
 0x20b   :  { %2465 = vmatprep.subr.bf16.mxu0 %v3363_v38 }
 0x20e   :  { %2466 = vmatpush1.bf16.msra.mxu0 %v3361_v39 }
 0x20f   :  { %2467 = vmatprep.subr.bf16.mxu0 %v3366_v40 }
 0x212   :  { %2468 = vmatpush1.bf16.msra.mxu0 %v3364_v41 }
 0x24a   :  { %v1977_v46 = vpop.f32.mrb[4].mxu1 }
 0x24b   :  { %v2844_v47 = vadd.f32 %v1977_v46, %v339_v44  ;;  %v1979_v48 = vpop.f32.mrb[5].mxu1 }
 0x24c   :  { %v2845_v49 = vadd.f32 %v1979_v48, %v343_v45  ;;  %v1981_v50 = vpop.f32.mrb[6].mxu1 }
 0x24d   :  { %vm1986_vm2 = vcmp.gt.f32.partialorder %v2844_v47, 0.0  ;;  %v1990_v52 = vmul.f32 0.2, %v2844_v47  ;;  %v1982_v53 = vpop.f32.mrb[7].mxu1 }
 0x24e   :  { %vm1987_vm3 = vcmp.gt.f32.partialorder %v2845_v49, 0.0  ;;  %v1991_v54 = vmul.f32 0.2, %v2845_v49 }
 0x24f   :  { %v1994_v55 = vsel %vm1986_vm2, %v2844_v47, %v1990_v52 }
 0x250   :  { %v1995_v60 = vsel %vm1987_vm3, %v2845_v49, %v1991_v54  ;;  %v1998_v61 = vpack.c.bf16 %v1994_v55, %v1994_v55 }
 0x251   :  { %v1999_v21 = vpack.c.bf16 %v1995_v60, %v1995_v60 }
 0x253   :  { %2469 = vmatprep.mubr.bf16.mxu0 %v1999_v21 }
 0x254   :  { %2470 = vmatmul.mubr.bf16.vlgmr.msra.gmra.mrb[4].mxu0 %v1998_v61 }
 0x327   :  { %v2471_v0 = vpop.f32.mrb[4].mxu0 }
 0x328   :  { %v2846_v1 = vadd.f32 %v2471_v0, %v2069_v58  ;;  %v2473_v2 = vpop.f32.mrb[5].mxu0 }
 0x329   :  { %v2847_v3 = vadd.f32 %v2473_v2, %v2073_v62  ;;  %v2475_v4 = vpop.f32.mrb[6].mxu0 }
 0x32a   :  { %vm2478_vm4 = vcmp.gt.f32.partialorder %v2846_v1, 0.0  ;;  %v2480_v8 = vmul.f32 0.2, %v2846_v1  ;;  %v2476_v9 = vpop.f32.mrb[7].mxu0 }
 0x32b   :  { %vm2479_vm5 = vcmp.gt.f32.partialorder %v2847_v3, 0.0  ;;  %v2481_v11 = vmul.f32 0.2, %v2847_v3 }
 0x32c   :  { %v2482_v12 = vsel %vm2478_vm4, %v2846_v1, %v2480_v8 }
 0x32d   :  { %v2483_v14 = vsel %vm2479_vm5, %v2847_v3, %v2481_v11  ;;  %v2496_v15 = vmul.f32 %v2489_v5, %v2482_v12 }
 0x32e   :  { %v2497_v16 = vmul.f32 %v2493_v10, %v2483_v14 }
 0x330   :  { %v2498_v17 = vadd.f32 %v2497_v16, %v2496_v15 }
 0x332   :  { %2499 = vadd.xlane.f32.xlu0 %v2498_v17 }
 0x3bf   :  { %v2500_v22 = vpop.xlane.xlu0 %2499 }
 0x3c0   :  { %v2503_v57 = vadd.f32 %v2502_v20, %v2500_v22 }
 0x3c2   :  { %2505 = vst.msk [vmem:[%s3608_s7] sm:$0xff] %vm2504_vm6, %v2503_v57 }
 0x3c3   :  { %2510 = vsyncpa [#allocation4], 1 }
 0x3c4   :  { %2511 = vsyncpa [#allocation6], 1 }

</bundles_post_ra>
